<compile_context>
chip_gen: v6e
topology: v6e:2x2x1
jax: 0.10.0
libtpu: 0.0.40
codegen_flags: <defaults>
</compile_context>

<pallas_src>
import jax
import jax.numpy as jnp
from jax import lax
from jax.experimental import pallas as pl
from jax.experimental.pallas import tpu as pltpu

KMEANS_ITERS = 16  # unrolled Lloyd iterations (fixed point ~= "until converged")


# ----------------------------------------------------------------------------
# Kernel 1: GRU backbone (returns last hidden state)
# ----------------------------------------------------------------------------
def gru_kernel(x_ref, wir_ref, wiz_ref, win_ref,
               whr_ref, whz_ref, whn_ref,
               bih_ref, bhh_ref, h_ref):
    ti = pl.program_id(1)
    Tc, Bb, D = x_ref.shape
    H = h_ref.shape[1]
    f32 = jnp.float32

    @pl.when(ti == 0)
    def _():
        h_ref[...] = jnp.zeros_like(h_ref)

    # --- hoisted input projection for the whole time chunk (one matmul/gate) ---
    xx = x_ref[...].reshape(Tc * Bb, D)                        # time-major rows
    gi_r = (jnp.dot(xx, wir_ref[...], preferred_element_type=f32)
            + bih_ref[0:1, :]).reshape(Tc, Bb, H)
    gi_z = (jnp.dot(xx, wiz_ref[...], preferred_element_type=f32)
            + bih_ref[1:2, :]).reshape(Tc, Bb, H)
    gi_n = (jnp.dot(xx, win_ref[...], preferred_element_type=f32)
            + bih_ref[2:3, :]).reshape(Tc, Bb, H)

    bh_r = bhh_ref[0:1, :]
    bh_z = bhh_ref[1:2, :]
    bh_n = bhh_ref[2:3, :]
    wr = whr_ref[...]
    wz = whz_ref[...]
    wn = whn_ref[...]

    # --- sequential recurrence: only h @ W_hh remains on the critical path ---
    h = h_ref[...]
    for t in range(Tc):                      # static unrolled loop, static slices
        gh_r = jnp.dot(h, wr, preferred_element_type=f32) + bh_r
        gh_z = jnp.dot(h, wz, preferred_element_type=f32) + bh_z
        gh_n = jnp.dot(h, wn, preferred_element_type=f32) + bh_n
        r = jax.nn.sigmoid(gi_r[t] + gh_r)
        z = jax.nn.sigmoid(gi_z[t] + gh_z)
        n = jnp.tanh(gi_n[t] + r * gh_n)
        h = (1.0 - z) * n + z * h
    h_ref[...] = h                           # resident across the time axis


def _largest_divisor_leq(n, cap):
    for d in range(min(n, cap), 0, -1):
        if n % d == 0:
            return d
    return n


def gru_forward(x, p, *, time_chunk=None, batch_block=None):
    B, T, D = x.shape
    H = p["w_hh_r"].shape[0]
    Tc = time_chunk if time_chunk is not None else _largest_divisor_leq(T, 32)
    Bb = batch_block if batch_block is not None else B   # if Bb < B, Bb % 8 == 0
    assert T % Tc == 0 and B % Bb == 0

    # time-major layout so per-timestep slices of the hoisted projection are
    # contiguous (leading-axis static slices)
    x_tm = jnp.transpose(x, (1, 0, 2))                    # (T, B, D)

    const2 = lambda bi, ti: (0, 0)
    return pl.pallas_call(
        gru_kernel,
        out_shape=jax.ShapeDtypeStruct((B, H), jnp.float32),
        grid_spec=pltpu.PrefetchScalarGridSpec(
            num_scalar_prefetch=0,
            grid=(B // Bb, T // Tc),
            in_specs=[
                pl.BlockSpec((Tc, Bb, D), lambda bi, ti: (ti, bi, 0)),
                pl.BlockSpec((D, H), const2),
                pl.BlockSpec((D, H), const2),
                pl.BlockSpec((D, H), const2),
                pl.BlockSpec((H, H), const2),
                pl.BlockSpec((H, H), const2),
                pl.BlockSpec((H, H), const2),
                pl.BlockSpec((3, H), const2),
                pl.BlockSpec((3, H), const2),
            ],
            out_specs=pl.BlockSpec((Bb, H), lambda bi, ti: (bi, 0)),
        ),
        compiler_params=pltpu.CompilerParams(
            dimension_semantics=("parallel", "arbitrary")),
    )(x_tm, p["w_ih_r"], p["w_ih_z"], p["w_ih_n"],
      p["w_hh_r"], p["w_hh_z"], p["w_hh_n"], p["b_ih"], p["b_hh"])


# ----------------------------------------------------------------------------
# Kernel 2: GRASP head (k-means + hard gumbel-softmax + GCNs + fusion)
# ----------------------------------------------------------------------------
def grasp_head_kernel(hidden_ref, sel_ref, gnoise_ref,
                      g1w_ref, g1b_ref, g2w_ref, g2b_ref,
                      w1w_ref, w1b_ref, w2w_ref, w2b_ref,
                      out_ref):
    h = hidden_ref[...]                                   # (N, H) f32
    N, H = h.shape
    K = sel_ref.shape[0]
    f32 = jnp.float32
    cols = lax.broadcasted_iota(jnp.int32, (N, K), 1)
    h3 = h[:, None, :]                                    # hoisted, loop-invariant

    def assign(centers):
        # reference distance form: ||c||^2 - 2 h.c  (the ||h||^2 row constant
        # is dropped — it cannot change the per-row argmin). K is tiny, so the
        # broadcasted VPU reduce beats a lane-starved MXU result.
        hc = jnp.sum(h3 * centers[None, :, :], axis=-1)   # (N, K)
        cn = jnp.sum(centers * centers, axis=-1)[None, :]  # (1, K)
        d = cn - 2.0 * hc
        rowmin = jnp.min(d, axis=-1, keepdims=True)
        code = jnp.min(jnp.where(d <= rowmin, cols, K), axis=-1, keepdims=True)
        return (cols == code).astype(f32)                 # one-hot codes (N, K)

    def centers_from(S):
        # centers = diag(1/max(cnt,1)) @ S^T @ h ; fold the divide into S's
        # columns so no (1,K)->(K,1) transpose is needed.
        cnt = jnp.sum(S, axis=0, keepdims=True)           # (1, K)
        cnt = jnp.where(cnt > 0.5, cnt, 1.0)
        return lax.dot_general(S / cnt, h, (((0,), (0,)), ((), ())),
                               preferred_element_type=f32)  # (K, H)

    # --- k-means (cluster()): random-init centers, unrolled Lloyd iterations ---
    c0 = jnp.dot(sel_ref[...], h, preferred_element_type=f32)
    S = assign(c0)
    S = lax.fori_loop(0, KMEANS_ITERS, lambda i, s: assign(centers_from(s)), S,
                      unroll=True)
    centers = centers_from(S)

    # --- e = relu(hidden @ centers^T) on the VPU; hard gumbel-softmax, T=1 ---
    e = jnp.maximum(jnp.sum(h3 * centers[None, :, :], axis=-1), 0.0)   # (N, K)
    # hard=True: forward value is exactly one_hot(argmax(e + gumbel)); the
    # softmax normalisation is monotone so it does not change the argmax.
    y = e + gnoise_ref[...]
    rowmax = jnp.max(y, axis=-1, keepdims=True)
    ind = jnp.min(jnp.where(y >= rowmax, cols, K), axis=-1, keepdims=True)
    scores = (cols == ind).astype(f32)                    # hard one-hot (N, K)

    # --- two GraphConvolution layers; adj is always identity in this path ---
    h1 = jnp.maximum(jnp.dot(centers, g1w_ref[...], preferred_element_type=f32)
                     + g1b_ref[...], 0.0)
    h2 = jnp.maximum(jnp.dot(h1, g2w_ref[...], preferred_element_type=f32)
                     + g2b_ref[...], 0.0)

    # --- fusion; weight1/weight2 (H -> 1) as VPU row reductions ---
    clu = jnp.dot(scores, h2, preferred_element_type=f32)              # (N, H)
    w1 = jax.nn.sigmoid(jnp.sum(clu * w1w_ref[...], axis=-1, keepdims=True)
                        + w1b_ref[...])                                 # (N, 1)
    w2 = jax.nn.sigmoid(jnp.sum(h * w2w_ref[...], axis=-1, keepdims=True)
                        + w2b_ref[...])                                 # (N, 1)
    w1 = w1 / (w1 + w2)
    out_ref[...] = w1 * clu + (1.0 - w1) * h


def _full_spec(shape):
    nd = len(shape)
    return pl.BlockSpec(shape, lambda i, nd=nd: (0,) * nd)


def grasp_head(hidden, sel, gnoise, params):
    N, H = hidden.shape
    args = (hidden, sel, gnoise,
            params["gcn1_w"], params["gcn1_b"],
            params["gcn2_w"], params["gcn2_b"],
            params["w1_w"], params["w1_b"],
            params["w2_w"], params["w2_b"])
    return pl.pallas_call(
        grasp_head_kernel,
        out_shape=jax.ShapeDtypeStruct((N, H), jnp.float32),
        grid_spec=pltpu.PrefetchScalarGridSpec(
            num_scalar_prefetch=0,
            grid=(1,),
            in_specs=[_full_spec(a.shape) for a in args],
            out_specs=_full_spec((N, H)),
        ),
        compiler_params=pltpu.CompilerParams(dimension_semantics=("arbitrary",)),
    )(*args)


# ----------------------------------------------------------------------------
# Parameter init (deterministic, matching shapes of the module's __init__)
# ----------------------------------------------------------------------------
def init_params(key, input_dim, hidden_dim):
    D, H = input_dim, hidden_dim
    ks = jax.random.split(key, 16)
    u = lambda k, shape, b: jax.random.uniform(k, shape, jnp.float32, -b, b)
    gru_b = 1.0 / (H ** 0.5)
    gcn_b = 1.0 / (H ** 0.5)    # GraphConvolution: std = 1/sqrt(out_features)
    lin_b = 1.0 / (H ** 0.5)
    return {
        # GRU backbone, per-gate weights (lane-aligned gate outputs), order r|z|n
        "w_ih_r": u(ks[0], (D, H), gru_b),
        "w_ih_z": u(ks[1], (D, H), gru_b),
        "w_ih_n": u(ks[2], (D, H), gru_b),
        "w_hh_r": u(ks[3], (H, H), gru_b),
        "w_hh_z": u(ks[4], (H, H), gru_b),
        "w_hh_n": u(ks[5], (H, H), gru_b),
        "b_ih": u(ks[6], (3, H), gru_b),   # rows: r, z, n
        "b_hh": u(ks[7], (3, H), gru_b),
        # GraphConvolution x2  (weight: [H, H], bias: [H])
        "gcn1_w": u(ks[8], (H, H), gcn_b),
        "gcn1_b": u(ks[9], (1, H), gcn_b),
        "gcn2_w": u(ks[10], (H, H), gcn_b),
        "gcn2_b": u(ks[11], (1, H), gcn_b),
        # weight1, weight2: nn.Linear(H, 1), stored as row vectors for VPU reduce
        "w1_w": u(ks[12], (1, H), lin_b),
        "w1_b": u(ks[13], (1, 1), lin_b),
        "w2_w": u(ks[14], (1, H), lin_b),
        "w2_b": u(ks[15], (1, 1), lin_b),
    }


def grasp_layer_forward(x, params, cluster_num, key):
    """GRASPLayer.forward for x: [B, T, D] -> [B, H] (mask=None, static=None)."""
    B, T, D = x.shape
    assert cluster_num <= B, "cluster_num must be <= batch size"

    # backbone -> hidden_t [B, H]
    hidden_t = gru_forward(x, params)

    # glue randomness (host RNG in the PyTorch original):
    k_init, k_gumbel = jax.random.split(key)
    init_idx = jax.random.permutation(k_init, B)[:cluster_num]        # distinct
    sel = jax.nn.one_hot(init_idx, B, dtype=jnp.float32)              # (K, B)
    U = jax.random.uniform(k_gumbel, (B, cluster_num), jnp.float32)
    gnoise = -jnp.log(-jnp.log(U + 1e-20) + 1e-20)                    # sample_gumbel

    final_h = grasp_head(hidden_t, sel, gnoise, params)
    # dropout: identity (eval-mode)
    return final_h


if __name__ == "__main__":
    B, T, D, H, K = 8, 8, 16, 32, 2

    key = jax.random.PRNGKey(0)
    k_x, k_p, k_r = jax.random.split(key, 3)
    x = jax.random.normal(k_x, (B, T, D), dtype=jnp.float32)
    params = init_params(k_p, D, H)

    out = grasp_layer_forward(x, params, K, k_r)
    out = jax.block_until_ready(out)
    assert out.shape == (B, H) and out.dtype == jnp.float32
    assert bool(jnp.all(jnp.isfinite(out)))
    print("KERNEL_OK")
</pallas_src>

<mosaic_0001>
module attributes {stable_mosaic.version = 11 : i64} {
  func.func @gru_kernel(%arg0: i32, %arg1: i32, %arg2: memref<8x8x16xf32, #tpu.memory_space<vmem>>, %arg3: memref<16x32xf32, #tpu.memory_space<vmem>>, %arg4: memref<16x32xf32, #tpu.memory_space<vmem>>, %arg5: memref<16x32xf32, #tpu.memory_space<vmem>>, %arg6: memref<32x32xf32, #tpu.memory_space<vmem>>, %arg7: memref<32x32xf32, #tpu.memory_space<vmem>>, %arg8: memref<32x32xf32, #tpu.memory_space<vmem>>, %arg9: memref<3x32xf32, #tpu.memory_space<vmem>>, %arg10: memref<3x32xf32, #tpu.memory_space<vmem>>, %arg11: memref<8x32xf32, #tpu.memory_space<vmem>>) attributes {dimension_semantics = [#tpu.dimension_semantics<parallel>, #tpu.dimension_semantics<arbitrary>], iteration_bounds = array<i64: 1, 1>, scalar_prefetch = 0 : i64, scratch_operands = 0 : i64, tpu.core_type = #tpu.core_type<tc>, window_params = [{transform_indices = @transform_0, window_bounds = array<i64: 8, 8, 16>}, {pipeline_mode = #tpu.pipeline_mode<synchronous>, transform_indices = @transform_1, window_bounds = array<i64: 16, 32>}, {pipeline_mode = #tpu.pipeline_mode<synchronous>, transform_indices = @transform_2, window_bounds = array<i64: 16, 32>}, {pipeline_mode = #tpu.pipeline_mode<synchronous>, transform_indices = @transform_3, window_bounds = array<i64: 16, 32>}, {pipeline_mode = #tpu.pipeline_mode<synchronous>, transform_indices = @transform_4, window_bounds = array<i64: 32, 32>}, {pipeline_mode = #tpu.pipeline_mode<synchronous>, transform_indices = @transform_5, window_bounds = array<i64: 32, 32>}, {pipeline_mode = #tpu.pipeline_mode<synchronous>, transform_indices = @transform_6, window_bounds = array<i64: 32, 32>}, {pipeline_mode = #tpu.pipeline_mode<synchronous>, transform_indices = @transform_7, window_bounds = array<i64: 3, 32>}, {pipeline_mode = #tpu.pipeline_mode<synchronous>, transform_indices = @transform_8, window_bounds = array<i64: 3, 32>}, {transform_indices = @transform_9, window_bounds = array<i64: 8, 32>}]} {
    %c0_i32 = arith.constant 0 : i32
    %0 = arith.cmpi eq, %arg1, %c0_i32 : i32
    %1 = arith.extui %0 : i1 to i32
    %c0_i32_0 = arith.constant 0 : i32
    %2 = arith.cmpi ne, %1, %c0_i32_0 : i32
    scf.if %2 {
      %cst_79 = arith.constant 0.000000e+00 : f32
      %311 = vector.broadcast %cst_79 : f32 to vector<8x32xf32>
      %c0_80 = arith.constant 0 : index
      %c0_81 = arith.constant 0 : index
      %312 = vector.load %arg11[%c0_80, %c0_81] : memref<8x32xf32, #tpu.memory_space<vmem>>, vector<8x32xf32>
      tpu.vector_store %arg11[%c0_80, %c0_81], %311 {strides = array<i32>} : memref<8x32xf32, #tpu.memory_space<vmem>>, vector<8x32xf32>,
    } else {
    }
    %c0 = arith.constant 0 : index
    %c0_1 = arith.constant 0 : index
    %c0_2 = arith.constant 0 : index
    %3 = vector.load %arg2[%c0, %c0_1, %c0_2] : memref<8x8x16xf32, #tpu.memory_space<vmem>>, vector<8x8x16xf32>
    %4 = vector.shape_cast %3 : vector<8x8x16xf32> to vector<64x16xf32>
    %c0_3 = arith.constant 0 : index
    %c0_4 = arith.constant 0 : index
    %5 = vector.load %arg3[%c0_3, %c0_4] : memref<16x32xf32, #tpu.memory_space<vmem>>, vector<16x32xf32>
    %cst = arith.constant dense<0.000000e+00> : vector<64x32xf32>
    %6 = tpu.matmul %4, %5, %cst {dimension_numbers = #tpu.dot_dimension_numbers<[1], [0], [0], [1], [0, 0, 1, 1], [], []>} : vector<64x16xf32>, vector<16x32xf32>, vector<64x32xf32> -> vector<64x32xf32>
    %c0_5 = arith.constant 0 : index
    %c0_6 = arith.constant 0 : index
    %7 = vector.load %arg9[%c0_5, %c0_6] : memref<3x32xf32, #tpu.memory_space<vmem>>, vector<1x32xf32>
    %8 = vector.broadcast %7 : vector<1x32xf32> to vector<64x32xf32>
    %9 = arith.addf %6, %8 : vector<64x32xf32>
    %10 = vector.shape_cast %9 : vector<64x32xf32> to vector<8x8x32xf32>
    %c0_7 = arith.constant 0 : index
    %c0_8 = arith.constant 0 : index
    %11 = vector.load %arg4[%c0_7, %c0_8] : memref<16x32xf32, #tpu.memory_space<vmem>>, vector<16x32xf32>
    %cst_9 = arith.constant dense<0.000000e+00> : vector<64x32xf32>
    %12 = tpu.matmul %4, %11, %cst_9 {dimension_numbers = #tpu.dot_dimension_numbers<[1], [0], [0], [1], [0, 0, 1, 1], [], []>} : vector<64x16xf32>, vector<16x32xf32>, vector<64x32xf32> -> vector<64x32xf32>
    %c1 = arith.constant 1 : index
    %c0_10 = arith.constant 0 : index
    %13 = vector.load %arg9[%c1, %c0_10] : memref<3x32xf32, #tpu.memory_space<vmem>>, vector<1x32xf32>
    %14 = vector.broadcast %13 : vector<1x32xf32> to vector<64x32xf32>
    %15 = arith.addf %12, %14 : vector<64x32xf32>
    %16 = vector.shape_cast %15 : vector<64x32xf32> to vector<8x8x32xf32>
    %c0_11 = arith.constant 0 : index
    %c0_12 = arith.constant 0 : index
    %17 = vector.load %arg5[%c0_11, %c0_12] : memref<16x32xf32, #tpu.memory_space<vmem>>, vector<16x32xf32>
    %cst_13 = arith.constant dense<0.000000e+00> : vector<64x32xf32>
    %18 = tpu.matmul %4, %17, %cst_13 {dimension_numbers = #tpu.dot_dimension_numbers<[1], [0], [0], [1], [0, 0, 1, 1], [], []>} : vector<64x16xf32>, vector<16x32xf32>, vector<64x32xf32> -> vector<64x32xf32>
    %c2 = arith.constant 2 : index
    %c0_14 = arith.constant 0 : index
    %19 = vector.load %arg9[%c2, %c0_14] : memref<3x32xf32, #tpu.memory_space<vmem>>, vector<1x32xf32>
    %20 = vector.broadcast %19 : vector<1x32xf32> to vector<64x32xf32>
    %21 = arith.addf %18, %20 : vector<64x32xf32>
    %22 = vector.shape_cast %21 : vector<64x32xf32> to vector<8x8x32xf32>
    %c0_15 = arith.constant 0 : index
    %c0_16 = arith.constant 0 : index
    %23 = vector.load %arg10[%c0_15, %c0_16] : memref<3x32xf32, #tpu.memory_space<vmem>>, vector<1x32xf32>
    %c1_17 = arith.constant 1 : index
    %c0_18 = arith.constant 0 : index
    %24 = vector.load %arg10[%c1_17, %c0_18] : memref<3x32xf32, #tpu.memory_space<vmem>>, vector<1x32xf32>
    %c2_19 = arith.constant 2 : index
    %c0_20 = arith.constant 0 : index
    %25 = vector.load %arg10[%c2_19, %c0_20] : memref<3x32xf32, #tpu.memory_space<vmem>>, vector<1x32xf32>
    %c0_21 = arith.constant 0 : index
    %c0_22 = arith.constant 0 : index
    %26 = vector.load %arg6[%c0_21, %c0_22] : memref<32x32xf32, #tpu.memory_space<vmem>>, vector<32x32xf32>
    %c0_23 = arith.constant 0 : index
    %c0_24 = arith.constant 0 : index
    %27 = vector.load %arg7[%c0_23, %c0_24] : memref<32x32xf32, #tpu.memory_space<vmem>>, vector<32x32xf32>
    %c0_25 = arith.constant 0 : index
    %c0_26 = arith.constant 0 : index
    %28 = vector.load %arg8[%c0_25, %c0_26] : memref<32x32xf32, #tpu.memory_space<vmem>>, vector<32x32xf32>
    %c0_27 = arith.constant 0 : index
    %c0_28 = arith.constant 0 : index
    %29 = vector.load %arg11[%c0_27, %c0_28] : memref<8x32xf32, #tpu.memory_space<vmem>>, vector<8x32xf32>
    %cst_29 = arith.constant dense<0.000000e+00> : vector<8x32xf32>
    %30 = tpu.matmul %29, %26, %cst_29 {dimension_numbers = #tpu.dot_dimension_numbers<[1], [0], [0], [1], [0, 0, 1, 1], [], []>} : vector<8x32xf32>, vector<32x32xf32>, vector<8x32xf32> -> vector<8x32xf32>
    %31 = vector.broadcast %23 : vector<1x32xf32> to vector<8x32xf32>
    %32 = arith.addf %30, %31 : vector<8x32xf32>
    %cst_30 = arith.constant dense<0.000000e+00> : vector<8x32xf32>
    %33 = tpu.matmul %29, %27, %cst_30 {dimension_numbers = #tpu.dot_dimension_numbers<[1], [0], [0], [1], [0, 0, 1, 1], [], []>} : vector<8x32xf32>, vector<32x32xf32>, vector<8x32xf32> -> vector<8x32xf32>
    %34 = vector.broadcast %24 : vector<1x32xf32> to vector<8x32xf32>
    %35 = arith.addf %33, %34 : vector<8x32xf32>
    %cst_31 = arith.constant dense<0.000000e+00> : vector<8x32xf32>
    %36 = tpu.matmul %29, %28, %cst_31 {dimension_numbers = #tpu.dot_dimension_numbers<[1], [0], [0], [1], [0, 0, 1, 1], [], []>} : vector<8x32xf32>, vector<32x32xf32>, vector<8x32xf32> -> vector<8x32xf32>
    %37 = vector.broadcast %25 : vector<1x32xf32> to vector<8x32xf32>
    %38 = arith.addf %36, %37 : vector<8x32xf32>
    %39 = vector.extract_strided_slice %10 {offsets = [0, 0, 0], sizes = [1, 8, 32], strides = [1, 1, 1]} : vector<8x8x32xf32> to vector<1x8x32xf32>
    %40 = vector.shape_cast %39 : vector<1x8x32xf32> to vector<8x32xf32>
    %41 = arith.addf %40, %32 : vector<8x32xf32>
    %42 = arith.negf %41 : vector<8x32xf32>
    %43 = math.exp %42 : vector<8x32xf32>
    %cst_32 = arith.constant 1.000000e+00 : f32
    %44 = vector.broadcast %cst_32 : f32 to vector<8x32xf32>
    %45 = arith.addf %44, %43 : vector<8x32xf32>
    %46 = arith.divf %44, %45 : vector<8x32xf32>
    %47 = vector.extract_strided_slice %16 {offsets = [0, 0, 0], sizes = [1, 8, 32], strides = [1, 1, 1]} : vector<8x8x32xf32> to vector<1x8x32xf32>
    %48 = vector.shape_cast %47 : vector<1x8x32xf32> to vector<8x32xf32>
    %49 = arith.addf %48, %35 : vector<8x32xf32>
    %50 = arith.negf %49 : vector<8x32xf32>
    %51 = math.exp %50 : vector<8x32xf32>
    %cst_33 = arith.constant 1.000000e+00 : f32
    %52 = vector.broadcast %cst_33 : f32 to vector<8x32xf32>
    %53 = arith.addf %52, %51 : vector<8x32xf32>
    %54 = arith.divf %52, %53 : vector<8x32xf32>
    %55 = vector.extract_strided_slice %22 {offsets = [0, 0, 0], sizes = [1, 8, 32], strides = [1, 1, 1]} : vector<8x8x32xf32> to vector<1x8x32xf32>
    %56 = vector.shape_cast %55 : vector<1x8x32xf32> to vector<8x32xf32>
    %57 = arith.mulf %46, %38 : vector<8x32xf32>
    %58 = arith.addf %56, %57 : vector<8x32xf32>
    %59 = math.tanh %58 : vector<8x32xf32>
    %cst_34 = arith.constant 1.000000e+00 : f32
    %60 = vector.broadcast %cst_34 : f32 to vector<8x32xf32>
    %61 = arith.subf %60, %54 : vector<8x32xf32>
    %62 = arith.mulf %61, %59 : vector<8x32xf32>
    %63 = arith.mulf %54, %29 : vector<8x32xf32>
    %64 = arith.addf %62, %63 : vector<8x32xf32>
    %cst_35 = arith.constant dense<0.000000e+00> : vector<8x32xf32>
    %65 = tpu.matmul %64, %26, %cst_35 {dimension_numbers = #tpu.dot_dimension_numbers<[1], [0], [0], [1], [0, 0, 1, 1], [], []>} : vector<8x32xf32>, vector<32x32xf32>, vector<8x32xf32> -> vector<8x32xf32>
    %66 = vector.broadcast %23 : vector<1x32xf32> to vector<8x32xf32>
    %67 = arith.addf %65, %66 : vector<8x32xf32>
    %cst_36 = arith.constant dense<0.000000e+00> : vector<8x32xf32>
    %68 = tpu.matmul %64, %27, %cst_36 {dimension_numbers = #tpu.dot_dimension_numbers<[1], [0], [0], [1], [0, 0, 1, 1], [], []>} : vector<8x32xf32>, vector<32x32xf32>, vector<8x32xf32> -> vector<8x32xf32>
    %69 = vector.broadcast %24 : vector<1x32xf32> to vector<8x32xf32>
    %70 = arith.addf %68, %69 : vector<8x32xf32>
    %cst_37 = arith.constant dense<0.000000e+00> : vector<8x32xf32>
    %71 = tpu.matmul %64, %28, %cst_37 {dimension_numbers = #tpu.dot_dimension_numbers<[1], [0], [0], [1], [0, 0, 1, 1], [], []>} : vector<8x32xf32>, vector<32x32xf32>, vector<8x32xf32> -> vector<8x32xf32>
    %72 = vector.broadcast %25 : vector<1x32xf32> to vector<8x32xf32>
    %73 = arith.addf %71, %72 : vector<8x32xf32>
    %74 = vector.extract_strided_slice %10 {offsets = [1, 0, 0], sizes = [1, 8, 32], strides = [1, 1, 1]} : vector<8x8x32xf32> to vector<1x8x32xf32>
    %75 = vector.shape_cast %74 : vector<1x8x32xf32> to vector<8x32xf32>
    %76 = arith.addf %75, %67 : vector<8x32xf32>
    %77 = arith.negf %76 : vector<8x32xf32>
    %78 = math.exp %77 : vector<8x32xf32>
    %cst_38 = arith.constant 1.000000e+00 : f32
    %79 = vector.broadcast %cst_38 : f32 to vector<8x32xf32>
    %80 = arith.addf %79, %78 : vector<8x32xf32>
    %81 = arith.divf %79, %80 : vector<8x32xf32>
    %82 = vector.extract_strided_slice %16 {offsets = [1, 0, 0], sizes = [1, 8, 32], strides = [1, 1, 1]} : vector<8x8x32xf32> to vector<1x8x32xf32>
    %83 = vector.shape_cast %82 : vector<1x8x32xf32> to vector<8x32xf32>
    %84 = arith.addf %83, %70 : vector<8x32xf32>
    %85 = arith.negf %84 : vector<8x32xf32>
    %86 = math.exp %85 : vector<8x32xf32>
    %cst_39 = arith.constant 1.000000e+00 : f32
    %87 = vector.broadcast %cst_39 : f32 to vector<8x32xf32>
    %88 = arith.addf %87, %86 : vector<8x32xf32>
    %89 = arith.divf %87, %88 : vector<8x32xf32>
    %90 = vector.extract_strided_slice %22 {offsets = [1, 0, 0], sizes = [1, 8, 32], strides = [1, 1, 1]} : vector<8x8x32xf32> to vector<1x8x32xf32>
    %91 = vector.shape_cast %90 : vector<1x8x32xf32> to vector<8x32xf32>
    %92 = arith.mulf %81, %73 : vector<8x32xf32>
    %93 = arith.addf %91, %92 : vector<8x32xf32>
    %94 = math.tanh %93 : vector<8x32xf32>
    %cst_40 = arith.constant 1.000000e+00 : f32
    %95 = vector.broadcast %cst_40 : f32 to vector<8x32xf32>
    %96 = arith.subf %95, %89 : vector<8x32xf32>
    %97 = arith.mulf %96, %94 : vector<8x32xf32>
    %98 = arith.mulf %89, %64 : vector<8x32xf32>
    %99 = arith.addf %97, %98 : vector<8x32xf32>
    %cst_41 = arith.constant dense<0.000000e+00> : vector<8x32xf32>
    %100 = tpu.matmul %99, %26, %cst_41 {dimension_numbers = #tpu.dot_dimension_numbers<[1], [0], [0], [1], [0, 0, 1, 1], [], []>} : vector<8x32xf32>, vector<32x32xf32>, vector<8x32xf32> -> vector<8x32xf32>
    %101 = vector.broadcast %23 : vector<1x32xf32> to vector<8x32xf32>
    %102 = arith.addf %100, %101 : vector<8x32xf32>
    %cst_42 = arith.constant dense<0.000000e+00> : vector<8x32xf32>
    %103 = tpu.matmul %99, %27, %cst_42 {dimension_numbers = #tpu.dot_dimension_numbers<[1], [0], [0], [1], [0, 0, 1, 1], [], []>} : vector<8x32xf32>, vector<32x32xf32>, vector<8x32xf32> -> vector<8x32xf32>
    %104 = vector.broadcast %24 : vector<1x32xf32> to vector<8x32xf32>
    %105 = arith.addf %103, %104 : vector<8x32xf32>
    %cst_43 = arith.constant dense<0.000000e+00> : vector<8x32xf32>
    %106 = tpu.matmul %99, %28, %cst_43 {dimension_numbers = #tpu.dot_dimension_numbers<[1], [0], [0], [1], [0, 0, 1, 1], [], []>} : vector<8x32xf32>, vector<32x32xf32>, vector<8x32xf32> -> vector<8x32xf32>
    %107 = vector.broadcast %25 : vector<1x32xf32> to vector<8x32xf32>
    %108 = arith.addf %106, %107 : vector<8x32xf32>
    %109 = vector.extract_strided_slice %10 {offsets = [2, 0, 0], sizes = [1, 8, 32], strides = [1, 1, 1]} : vector<8x8x32xf32> to vector<1x8x32xf32>
    %110 = vector.shape_cast %109 : vector<1x8x32xf32> to vector<8x32xf32>
    %111 = arith.addf %110, %102 : vector<8x32xf32>
    %112 = arith.negf %111 : vector<8x32xf32>
    %113 = math.exp %112 : vector<8x32xf32>
    %cst_44 = arith.constant 1.000000e+00 : f32
    %114 = vector.broadcast %cst_44 : f32 to vector<8x32xf32>
    %115 = arith.addf %114, %113 : vector<8x32xf32>
    %116 = arith.divf %114, %115 : vector<8x32xf32>
    %117 = vector.extract_strided_slice %16 {offsets = [2, 0, 0], sizes = [1, 8, 32], strides = [1, 1, 1]} : vector<8x8x32xf32> to vector<1x8x32xf32>
    %118 = vector.shape_cast %117 : vector<1x8x32xf32> to vector<8x32xf32>
    %119 = arith.addf %118, %105 : vector<8x32xf32>
    %120 = arith.negf %119 : vector<8x32xf32>
    %121 = math.exp %120 : vector<8x32xf32>
    %cst_45 = arith.constant 1.000000e+00 : f32
    %122 = vector.broadcast %cst_45 : f32 to vector<8x32xf32>
    %123 = arith.addf %122, %121 : vector<8x32xf32>
    %124 = arith.divf %122, %123 : vector<8x32xf32>
    %125 = vector.extract_strided_slice %22 {offsets = [2, 0, 0], sizes = [1, 8, 32], strides = [1, 1, 1]} : vector<8x8x32xf32> to vector<1x8x32xf32>
    %126 = vector.shape_cast %125 : vector<1x8x32xf32> to vector<8x32xf32>
    %127 = arith.mulf %116, %108 : vector<8x32xf32>
    %128 = arith.addf %126, %127 : vector<8x32xf32>
    %129 = math.tanh %128 : vector<8x32xf32>
    %cst_46 = arith.constant 1.000000e+00 : f32
    %130 = vector.broadcast %cst_46 : f32 to vector<8x32xf32>
    %131 = arith.subf %130, %124 : vector<8x32xf32>
    %132 = arith.mulf %131, %129 : vector<8x32xf32>
    %133 = arith.mulf %124, %99 : vector<8x32xf32>
    %134 = arith.addf %132, %133 : vector<8x32xf32>
    %cst_47 = arith.constant dense<0.000000e+00> : vector<8x32xf32>
    %135 = tpu.matmul %134, %26, %cst_47 {dimension_numbers = #tpu.dot_dimension_numbers<[1], [0], [0], [1], [0, 0, 1, 1], [], []>} : vector<8x32xf32>, vector<32x32xf32>, vector<8x32xf32> -> vector<8x32xf32>
    %136 = vector.broadcast %23 : vector<1x32xf32> to vector<8x32xf32>
    %137 = arith.addf %135, %136 : vector<8x32xf32>
    %cst_48 = arith.constant dense<0.000000e+00> : vector<8x32xf32>
    %138 = tpu.matmul %134, %27, %cst_48 {dimension_numbers = #tpu.dot_dimension_numbers<[1], [0], [0], [1], [0, 0, 1, 1], [], []>} : vector<8x32xf32>, vector<32x32xf32>, vector<8x32xf32> -> vector<8x32xf32>
    %139 = vector.broadcast %24 : vector<1x32xf32> to vector<8x32xf32>
    %140 = arith.addf %138, %139 : vector<8x32xf32>
    %cst_49 = arith.constant dense<0.000000e+00> : vector<8x32xf32>
    %141 = tpu.matmul %134, %28, %cst_49 {dimension_numbers = #tpu.dot_dimension_numbers<[1], [0], [0], [1], [0, 0, 1, 1], [], []>} : vector<8x32xf32>, vector<32x32xf32>, vector<8x32xf32> -> vector<8x32xf32>
    %142 = vector.broadcast %25 : vector<1x32xf32> to vector<8x32xf32>
    %143 = arith.addf %141, %142 : vector<8x32xf32>
    %144 = vector.extract_strided_slice %10 {offsets = [3, 0, 0], sizes = [1, 8, 32], strides = [1, 1, 1]} : vector<8x8x32xf32> to vector<1x8x32xf32>
    %145 = vector.shape_cast %144 : vector<1x8x32xf32> to vector<8x32xf32>
    %146 = arith.addf %145, %137 : vector<8x32xf32>
    %147 = arith.negf %146 : vector<8x32xf32>
    %148 = math.exp %147 : vector<8x32xf32>
    %cst_50 = arith.constant 1.000000e+00 : f32
    %149 = vector.broadcast %cst_50 : f32 to vector<8x32xf32>
    %150 = arith.addf %149, %148 : vector<8x32xf32>
    %151 = arith.divf %149, %150 : vector<8x32xf32>
    %152 = vector.extract_strided_slice %16 {offsets = [3, 0, 0], sizes = [1, 8, 32], strides = [1, 1, 1]} : vector<8x8x32xf32> to vector<1x8x32xf32>
    %153 = vector.shape_cast %152 : vector<1x8x32xf32> to vector<8x32xf32>
    %154 = arith.addf %153, %140 : vector<8x32xf32>
    %155 = arith.negf %154 : vector<8x32xf32>
    %156 = math.exp %155 : vector<8x32xf32>
    %cst_51 = arith.constant 1.000000e+00 : f32
    %157 = vector.broadcast %cst_51 : f32 to vector<8x32xf32>
    %158 = arith.addf %157, %156 : vector<8x32xf32>
    %159 = arith.divf %157, %158 : vector<8x32xf32>
    %160 = vector.extract_strided_slice %22 {offsets = [3, 0, 0], sizes = [1, 8, 32], strides = [1, 1, 1]} : vector<8x8x32xf32> to vector<1x8x32xf32>
    %161 = vector.shape_cast %160 : vector<1x8x32xf32> to vector<8x32xf32>
    %162 = arith.mulf %151, %143 : vector<8x32xf32>
    %163 = arith.addf %161, %162 : vector<8x32xf32>
    %164 = math.tanh %163 : vector<8x32xf32>
    %cst_52 = arith.constant 1.000000e+00 : f32
    %165 = vector.broadcast %cst_52 : f32 to vector<8x32xf32>
    %166 = arith.subf %165, %159 : vector<8x32xf32>
    %167 = arith.mulf %166, %164 : vector<8x32xf32>
    %168 = arith.mulf %159, %134 : vector<8x32xf32>
    %169 = arith.addf %167, %168 : vector<8x32xf32>
    %cst_53 = arith.constant dense<0.000000e+00> : vector<8x32xf32>
    %170 = tpu.matmul %169, %26, %cst_53 {dimension_numbers = #tpu.dot_dimension_numbers<[1], [0], [0], [1], [0, 0, 1, 1], [], []>} : vector<8x32xf32>, vector<32x32xf32>, vector<8x32xf32> -> vector<8x32xf32>
    %171 = vector.broadcast %23 : vector<1x32xf32> to vector<8x32xf32>
    %172 = arith.addf %170, %171 : vector<8x32xf32>
    %cst_54 = arith.constant dense<0.000000e+00> : vector<8x32xf32>
    %173 = tpu.matmul %169, %27, %cst_54 {dimension_numbers = #tpu.dot_dimension_numbers<[1], [0], [0], [1], [0, 0, 1, 1], [], []>} : vector<8x32xf32>, vector<32x32xf32>, vector<8x32xf32> -> vector<8x32xf32>
    %174 = vector.broadcast %24 : vector<1x32xf32> to vector<8x32xf32>
    %175 = arith.addf %173, %174 : vector<8x32xf32>
    %cst_55 = arith.constant dense<0.000000e+00> : vector<8x32xf32>
    %176 = tpu.matmul %169, %28, %cst_55 {dimension_numbers = #tpu.dot_dimension_numbers<[1], [0], [0], [1], [0, 0, 1, 1], [], []>} : vector<8x32xf32>, vector<32x32xf32>, vector<8x32xf32> -> vector<8x32xf32>
    %177 = vector.broadcast %25 : vector<1x32xf32> to vector<8x32xf32>
    %178 = arith.addf %176, %177 : vector<8x32xf32>
    %179 = vector.extract_strided_slice %10 {offsets = [4, 0, 0], sizes = [1, 8, 32], strides = [1, 1, 1]} : vector<8x8x32xf32> to vector<1x8x32xf32>
    %180 = vector.shape_cast %179 : vector<1x8x32xf32> to vector<8x32xf32>
    %181 = arith.addf %180, %172 : vector<8x32xf32>
    %182 = arith.negf %181 : vector<8x32xf32>
    %183 = math.exp %182 : vector<8x32xf32>
    %cst_56 = arith.constant 1.000000e+00 : f32
    %184 = vector.broadcast %cst_56 : f32 to vector<8x32xf32>
    %185 = arith.addf %184, %183 : vector<8x32xf32>
    %186 = arith.divf %184, %185 : vector<8x32xf32>
    %187 = vector.extract_strided_slice %16 {offsets = [4, 0, 0], sizes = [1, 8, 32], strides = [1, 1, 1]} : vector<8x8x32xf32> to vector<1x8x32xf32>
    %188 = vector.shape_cast %187 : vector<1x8x32xf32> to vector<8x32xf32>
    %189 = arith.addf %188, %175 : vector<8x32xf32>
    %190 = arith.negf %189 : vector<8x32xf32>
    %191 = math.exp %190 : vector<8x32xf32>
    %cst_57 = arith.constant 1.000000e+00 : f32
    %192 = vector.broadcast %cst_57 : f32 to vector<8x32xf32>
    %193 = arith.addf %192, %191 : vector<8x32xf32>
    %194 = arith.divf %192, %193 : vector<8x32xf32>
    %195 = vector.extract_strided_slice %22 {offsets = [4, 0, 0], sizes = [1, 8, 32], strides = [1, 1, 1]} : vector<8x8x32xf32> to vector<1x8x32xf32>
    %196 = vector.shape_cast %195 : vector<1x8x32xf32> to vector<8x32xf32>
    %197 = arith.mulf %186, %178 : vector<8x32xf32>
    %198 = arith.addf %196, %197 : vector<8x32xf32>
    %199 = math.tanh %198 : vector<8x32xf32>
    %cst_58 = arith.constant 1.000000e+00 : f32
    %200 = vector.broadcast %cst_58 : f32 to vector<8x32xf32>
    %201 = arith.subf %200, %194 : vector<8x32xf32>
    %202 = arith.mulf %201, %199 : vector<8x32xf32>
    %203 = arith.mulf %194, %169 : vector<8x32xf32>
    %204 = arith.addf %202, %203 : vector<8x32xf32>
    %cst_59 = arith.constant dense<0.000000e+00> : vector<8x32xf32>
    %205 = tpu.matmul %204, %26, %cst_59 {dimension_numbers = #tpu.dot_dimension_numbers<[1], [0], [0], [1], [0, 0, 1, 1], [], []>} : vector<8x32xf32>, vector<32x32xf32>, vector<8x32xf32> -> vector<8x32xf32>
    %206 = vector.broadcast %23 : vector<1x32xf32> to vector<8x32xf32>
    %207 = arith.addf %205, %206 : vector<8x32xf32>
    %cst_60 = arith.constant dense<0.000000e+00> : vector<8x32xf32>
    %208 = tpu.matmul %204, %27, %cst_60 {dimension_numbers = #tpu.dot_dimension_numbers<[1], [0], [0], [1], [0, 0, 1, 1], [], []>} : vector<8x32xf32>, vector<32x32xf32>, vector<8x32xf32> -> vector<8x32xf32>
    %209 = vector.broadcast %24 : vector<1x32xf32> to vector<8x32xf32>
    %210 = arith.addf %208, %209 : vector<8x32xf32>
    %cst_61 = arith.constant dense<0.000000e+00> : vector<8x32xf32>
    %211 = tpu.matmul %204, %28, %cst_61 {dimension_numbers = #tpu.dot_dimension_numbers<[1], [0], [0], [1], [0, 0, 1, 1], [], []>} : vector<8x32xf32>, vector<32x32xf32>, vector<8x32xf32> -> vector<8x32xf32>
    %212 = vector.broadcast %25 : vector<1x32xf32> to vector<8x32xf32>
    %213 = arith.addf %211, %212 : vector<8x32xf32>
    %214 = vector.extract_strided_slice %10 {offsets = [5, 0, 0], sizes = [1, 8, 32], strides = [1, 1, 1]} : vector<8x8x32xf32> to vector<1x8x32xf32>
    %215 = vector.shape_cast %214 : vector<1x8x32xf32> to vector<8x32xf32>
    %216 = arith.addf %215, %207 : vector<8x32xf32>
    %217 = arith.negf %216 : vector<8x32xf32>
    %218 = math.exp %217 : vector<8x32xf32>
    %cst_62 = arith.constant 1.000000e+00 : f32
    %219 = vector.broadcast %cst_62 : f32 to vector<8x32xf32>
    %220 = arith.addf %219, %218 : vector<8x32xf32>
    %221 = arith.divf %219, %220 : vector<8x32xf32>
    %222 = vector.extract_strided_slice %16 {offsets = [5, 0, 0], sizes = [1, 8, 32], strides = [1, 1, 1]} : vector<8x8x32xf32> to vector<1x8x32xf32>
    %223 = vector.shape_cast %222 : vector<1x8x32xf32> to vector<8x32xf32>
    %224 = arith.addf %223, %210 : vector<8x32xf32>
    %225 = arith.negf %224 : vector<8x32xf32>
    %226 = math.exp %225 : vector<8x32xf32>
    %cst_63 = arith.constant 1.000000e+00 : f32
    %227 = vector.broadcast %cst_63 : f32 to vector<8x32xf32>
    %228 = arith.addf %227, %226 : vector<8x32xf32>
    %229 = arith.divf %227, %228 : vector<8x32xf32>
    %230 = vector.extract_strided_slice %22 {offsets = [5, 0, 0], sizes = [1, 8, 32], strides = [1, 1, 1]} : vector<8x8x32xf32> to vector<1x8x32xf32>
    %231 = vector.shape_cast %230 : vector<1x8x32xf32> to vector<8x32xf32>
    %232 = arith.mulf %221, %213 : vector<8x32xf32>
    %233 = arith.addf %231, %232 : vector<8x32xf32>
    %234 = math.tanh %233 : vector<8x32xf32>
    %cst_64 = arith.constant 1.000000e+00 : f32
    %235 = vector.broadcast %cst_64 : f32 to vector<8x32xf32>
    %236 = arith.subf %235, %229 : vector<8x32xf32>
    %237 = arith.mulf %236, %234 : vector<8x32xf32>
    %238 = arith.mulf %229, %204 : vector<8x32xf32>
    %239 = arith.addf %237, %238 : vector<8x32xf32>
    %cst_65 = arith.constant dense<0.000000e+00> : vector<8x32xf32>
    %240 = tpu.matmul %239, %26, %cst_65 {dimension_numbers = #tpu.dot_dimension_numbers<[1], [0], [0], [1], [0, 0, 1, 1], [], []>} : vector<8x32xf32>, vector<32x32xf32>, vector<8x32xf32> -> vector<8x32xf32>
    %241 = vector.broadcast %23 : vector<1x32xf32> to vector<8x32xf32>
    %242 = arith.addf %240, %241 : vector<8x32xf32>
    %cst_66 = arith.constant dense<0.000000e+00> : vector<8x32xf32>
    %243 = tpu.matmul %239, %27, %cst_66 {dimension_numbers = #tpu.dot_dimension_numbers<[1], [0], [0], [1], [0, 0, 1, 1], [], []>} : vector<8x32xf32>, vector<32x32xf32>, vector<8x32xf32> -> vector<8x32xf32>
    %244 = vector.broadcast %24 : vector<1x32xf32> to vector<8x32xf32>
    %245 = arith.addf %243, %244 : vector<8x32xf32>
    %cst_67 = arith.constant dense<0.000000e+00> : vector<8x32xf32>
    %246 = tpu.matmul %239, %28, %cst_67 {dimension_numbers = #tpu.dot_dimension_numbers<[1], [0], [0], [1], [0, 0, 1, 1], [], []>} : vector<8x32xf32>, vector<32x32xf32>, vector<8x32xf32> -> vector<8x32xf32>
    %247 = vector.broadcast %25 : vector<1x32xf32> to vector<8x32xf32>
    %248 = arith.addf %246, %247 : vector<8x32xf32>
    %249 = vector.extract_strided_slice %10 {offsets = [6, 0, 0], sizes = [1, 8, 32], strides = [1, 1, 1]} : vector<8x8x32xf32> to vector<1x8x32xf32>
    %250 = vector.shape_cast %249 : vector<1x8x32xf32> to vector<8x32xf32>
    %251 = arith.addf %250, %242 : vector<8x32xf32>
    %252 = arith.negf %251 : vector<8x32xf32>
    %253 = math.exp %252 : vector<8x32xf32>
    %cst_68 = arith.constant 1.000000e+00 : f32
    %254 = vector.broadcast %cst_68 : f32 to vector<8x32xf32>
    %255 = arith.addf %254, %253 : vector<8x32xf32>
    %256 = arith.divf %254, %255 : vector<8x32xf32>
    %257 = vector.extract_strided_slice %16 {offsets = [6, 0, 0], sizes = [1, 8, 32], strides = [1, 1, 1]} : vector<8x8x32xf32> to vector<1x8x32xf32>
    %258 = vector.shape_cast %257 : vector<1x8x32xf32> to vector<8x32xf32>
    %259 = arith.addf %258, %245 : vector<8x32xf32>
    %260 = arith.negf %259 : vector<8x32xf32>
    %261 = math.exp %260 : vector<8x32xf32>
    %cst_69 = arith.constant 1.000000e+00 : f32
    %262 = vector.broadcast %cst_69 : f32 to vector<8x32xf32>
    %263 = arith.addf %262, %261 : vector<8x32xf32>
    %264 = arith.divf %262, %263 : vector<8x32xf32>
    %265 = vector.extract_strided_slice %22 {offsets = [6, 0, 0], sizes = [1, 8, 32], strides = [1, 1, 1]} : vector<8x8x32xf32> to vector<1x8x32xf32>
    %266 = vector.shape_cast %265 : vector<1x8x32xf32> to vector<8x32xf32>
    %267 = arith.mulf %256, %248 : vector<8x32xf32>
    %268 = arith.addf %266, %267 : vector<8x32xf32>
    %269 = math.tanh %268 : vector<8x32xf32>
    %cst_70 = arith.constant 1.000000e+00 : f32
    %270 = vector.broadcast %cst_70 : f32 to vector<8x32xf32>
    %271 = arith.subf %270, %264 : vector<8x32xf32>
    %272 = arith.mulf %271, %269 : vector<8x32xf32>
    %273 = arith.mulf %264, %239 : vector<8x32xf32>
    %274 = arith.addf %272, %273 : vector<8x32xf32>
    %cst_71 = arith.constant dense<0.000000e+00> : vector<8x32xf32>
    %275 = tpu.matmul %274, %26, %cst_71 {dimension_numbers = #tpu.dot_dimension_numbers<[1], [0], [0], [1], [0, 0, 1, 1], [], []>} : vector<8x32xf32>, vector<32x32xf32>, vector<8x32xf32> -> vector<8x32xf32>
    %276 = vector.broadcast %23 : vector<1x32xf32> to vector<8x32xf32>
    %277 = arith.addf %275, %276 : vector<8x32xf32>
    %cst_72 = arith.constant dense<0.000000e+00> : vector<8x32xf32>
    %278 = tpu.matmul %274, %27, %cst_72 {dimension_numbers = #tpu.dot_dimension_numbers<[1], [0], [0], [1], [0, 0, 1, 1], [], []>} : vector<8x32xf32>, vector<32x32xf32>, vector<8x32xf32> -> vector<8x32xf32>
    %279 = vector.broadcast %24 : vector<1x32xf32> to vector<8x32xf32>
    %280 = arith.addf %278, %279 : vector<8x32xf32>
    %cst_73 = arith.constant dense<0.000000e+00> : vector<8x32xf32>
    %281 = tpu.matmul %274, %28, %cst_73 {dimension_numbers = #tpu.dot_dimension_numbers<[1], [0], [0], [1], [0, 0, 1, 1], [], []>} : vector<8x32xf32>, vector<32x32xf32>, vector<8x32xf32> -> vector<8x32xf32>
    %282 = vector.broadcast %25 : vector<1x32xf32> to vector<8x32xf32>
    %283 = arith.addf %281, %282 : vector<8x32xf32>
    %284 = vector.extract_strided_slice %10 {offsets = [7, 0, 0], sizes = [1, 8, 32], strides = [1, 1, 1]} : vector<8x8x32xf32> to vector<1x8x32xf32>
    %285 = vector.shape_cast %284 : vector<1x8x32xf32> to vector<8x32xf32>
    %286 = arith.addf %285, %277 : vector<8x32xf32>
    %287 = arith.negf %286 : vector<8x32xf32>
    %288 = math.exp %287 : vector<8x32xf32>
    %cst_74 = arith.constant 1.000000e+00 : f32
    %289 = vector.broadcast %cst_74 : f32 to vector<8x32xf32>
    %290 = arith.addf %289, %288 : vector<8x32xf32>
    %291 = arith.divf %289, %290 : vector<8x32xf32>
    %292 = vector.extract_strided_slice %16 {offsets = [7, 0, 0], sizes = [1, 8, 32], strides = [1, 1, 1]} : vector<8x8x32xf32> to vector<1x8x32xf32>
    %293 = vector.shape_cast %292 : vector<1x8x32xf32> to vector<8x32xf32>
    %294 = arith.addf %293, %280 : vector<8x32xf32>
    %295 = arith.negf %294 : vector<8x32xf32>
    %296 = math.exp %295 : vector<8x32xf32>
    %cst_75 = arith.constant 1.000000e+00 : f32
    %297 = vector.broadcast %cst_75 : f32 to vector<8x32xf32>
    %298 = arith.addf %297, %296 : vector<8x32xf32>
    %299 = arith.divf %297, %298 : vector<8x32xf32>
    %300 = vector.extract_strided_slice %22 {offsets = [7, 0, 0], sizes = [1, 8, 32], strides = [1, 1, 1]} : vector<8x8x32xf32> to vector<1x8x32xf32>
    %301 = vector.shape_cast %300 : vector<1x8x32xf32> to vector<8x32xf32>
    %302 = arith.mulf %291, %283 : vector<8x32xf32>
    %303 = arith.addf %301, %302 : vector<8x32xf32>
    %304 = math.tanh %303 : vector<8x32xf32>
    %cst_76 = arith.constant 1.000000e+00 : f32
    %305 = vector.broadcast %cst_76 : f32 to vector<8x32xf32>
    %306 = arith.subf %305, %299 : vector<8x32xf32>
    %307 = arith.mulf %306, %304 : vector<8x32xf32>
    %308 = arith.mulf %299, %274 : vector<8x32xf32>
    %309 = arith.addf %307, %308 : vector<8x32xf32>
    %c0_77 = arith.constant 0 : index
    %c0_78 = arith.constant 0 : index
    %310 = vector.load %arg11[%c0_77, %c0_78] : memref<8x32xf32, #tpu.memory_space<vmem>>, vector<8x32xf32>
    tpu.vector_store %arg11[%c0_77, %c0_78], %309 {strides = array<i32>} : memref<8x32xf32, #tpu.memory_space<vmem>>, vector<8x32xf32>,
    return
  }
  func.func @transform_0(%arg0: i32, %arg1: i32) -> (i32, i32, i32) {
    %c0_i32 = arith.constant 0 : i32
    %c0_i32_0 = arith.constant 0 : i32
    return %arg1, %arg0, %c0_i32 : i32, i32, i32
  }
  func.func @transform_1(%arg0: i32, %arg1: i32) -> (i32, i32) {
    %c0_i32 = arith.constant 0 : i32
    %c0_i32_0 = arith.constant 0 : i32
    %c0_i32_1 = arith.constant 0 : i32
    return %c0_i32, %c0_i32_0 : i32, i32
  }
  func.func @transform_2(%arg0: i32, %arg1: i32) -> (i32, i32) {
    %c0_i32 = arith.constant 0 : i32
    %c0_i32_0 = arith.constant 0 : i32
    %c0_i32_1 = arith.constant 0 : i32
    return %c0_i32, %c0_i32_0 : i32, i32
  }
  func.func @transform_3(%arg0: i32, %arg1: i32) -> (i32, i32) {
    %c0_i32 = arith.constant 0 : i32
    %c0_i32_0 = arith.constant 0 : i32
    %c0_i32_1 = arith.constant 0 : i32
    return %c0_i32, %c0_i32_0 : i32, i32
  }
  func.func @transform_4(%arg0: i32, %arg1: i32) -> (i32, i32) {
    %c0_i32 = arith.constant 0 : i32
    %c0_i32_0 = arith.constant 0 : i32
    %c0_i32_1 = arith.constant 0 : i32
    return %c0_i32, %c0_i32_0 : i32, i32
  }
  func.func @transform_5(%arg0: i32, %arg1: i32) -> (i32, i32) {
    %c0_i32 = arith.constant 0 : i32
    %c0_i32_0 = arith.constant 0 : i32
    %c0_i32_1 = arith.constant 0 : i32
    return %c0_i32, %c0_i32_0 : i32, i32
  }
  func.func @transform_6(%arg0: i32, %arg1: i32) -> (i32, i32) {
    %c0_i32 = arith.constant 0 : i32
    %c0_i32_0 = arith.constant 0 : i32
    %c0_i32_1 = arith.constant 0 : i32
    return %c0_i32, %c0_i32_0 : i32, i32
  }
  func.func @transform_7(%arg0: i32, %arg1: i32) -> (i32, i32) {
    %c0_i32 = arith.constant 0 : i32
    %c0_i32_0 = arith.constant 0 : i32
    %c0_i32_1 = arith.constant 0 : i32
    return %c0_i32, %c0_i32_0 : i32, i32
  }
  func.func @transform_8(%arg0: i32, %arg1: i32) -> (i32, i32) {
    %c0_i32 = arith.constant 0 : i32
    %c0_i32_0 = arith.constant 0 : i32
    %c0_i32_1 = arith.constant 0 : i32
    return %c0_i32, %c0_i32_0 : i32, i32
  }
  func.func @transform_9(%arg0: i32, %arg1: i32) -> (i32, i32) {
    %c0_i32 = arith.constant 0 : i32
    %c0_i32_0 = arith.constant 0 : i32
    return %arg0, %c0_i32 : i32, i32
  }
}

</mosaic_0001>

<bundles_post_ra>
// kernel: tpu_custom_call.1
= control target key start
LH: loop header
LB: loop body
LE: loop exit
PB: predicated region body
PF: predicated region fallthrough
CT: control target
= control target key end

     0   :  { %14 = vsyncpa [#allocation3], 0  ;;  %s3781_s0 = inlined_call_operand.hbm [shape: f32[8,8,16], index: 0, kind: input, shape index: {}]   ;;  %s3782_s1 = inlined_call_operand.hbm [shape: f32[16,32], index: 1, kind: input, shape index: {}]   ;;  %s3783_s2 = inlined_call_operand.hbm [shape: f32[16,32], index: 2, kind: input, shape index: {}]   ;;  %s3784_s3 = inlined_call_operand.hbm [shape: f32[16,32], index: 3, kind: input, shape index: {}]   ;;  %s3785_s4 = inlined_call_operand.hbm [shape: f32[32,32], index: 4, kind: input, shape index: {}]   ;;  %s3786_s5 = inlined_call_operand.hbm [shape: f32[32,32], index: 5, kind: input, shape index: {}]   ;;  %s3787_s6 = inlined_call_operand.hbm [shape: f32[32,32], index: 6, kind: input, shape index: {}]   ;;  %s3788_s7 = inlined_call_operand.vmem [shape: f32[3,32], index: 7, kind: input, shape index: {}]   ;;  %s3789_s8 = inlined_call_operand.vmem [shape: f32[3,32], index: 8, kind: input, shape index: {}]   ;;  %s3790_s9 = inlined_call_operand.hbm [shape: f32[8,32], index: 9, kind: output, shape index: {}]  }
   0x1   :  { %15 = vsyncpa [#allocation6], 0 }
   0x2   :  { %16 = vsyncpa [#allocation9], 0 }
   0x3   :  { %17 = vsyncpa [#allocation12], 0 }
   0x4   :  { %18 = vsyncpa [#allocation4], 0  ;;  %s3217_s30 = smov [#allocation5]   ;;  %s3218_s11 = smov [#allocation8]  }
   0x5   :  { %s36_s10 = sshll.u32 %s3217_s30, 4  ;;  %s60_s12 = sshll.u32 %s3218_s11, 4  ;;  %s37_s10 = int_to_ptr.vmem [resolvable:$true] %s36_s10  ;;  %s61_s12 = int_to_ptr.vmem [resolvable:$true] %s60_s12 }
   0x6   :  { %s3055_s13 = scalar_lea.vmem %s37_s10, 256  ;;  %p3060_p1 = scmp.lt.s32.totalorder %s37_s10, %s37_s10 }
   0x7   :  { %p3056_p0 = scmp.ne.s32.totalorder %s37_s10, %s3055_s13  ;;  %p3061_p2 = scmp.lt.s32.totalorder %s3055_s13, %s3055_s13 }
   0x9   :  { %p3062_p3 = por %p3061_p2, %p3060_p1 }
   0xb   :  { %p3063_p4 = pnand %p3062_p3, %p3056_p0 }
   0xd   :  { %3066 = shalt.err (!%p3063_p4)
}
   0xe   :  { %s3219_s14 = smov 128   ;;  %s3220_s15 = smov 8  }
   0xf   :  { %42 = dma.hbm_to_vmem [thread:$0]  %s3782_s1, 256, %s37_s10, [#allocation6], %s3219_s14, %s3219_s14, %s3220_s15  }
  0x10   :  { %s3075_s18 = scalar_lea.vmem %s61_s12, 256  ;;  %p3080_p6 = scmp.lt.s32.totalorder %s61_s12, %s61_s12 }
  0x11   :  { %p3076_p5 = scmp.ne.s32.totalorder %s61_s12, %s3075_s18  ;;  %p3081_p7 = scmp.lt.s32.totalorder %s3075_s18, %s3075_s18 }
  0x13   :  { %p3082_p8 = por %p3081_p7, %p3080_p6 }
  0x15   :  { %p3083_p9 = pnand %p3082_p8, %p3076_p5 }
  0x17   :  { %3086 = shalt.err (!%p3083_p9)
}
  0x18   :  { %66 = dma.hbm_to_vmem [thread:$0]  %s3784_s3, 256, %s61_s12, [#allocation9], %s3219_s14, %s3219_s14, %s3220_s15  }
  0x19   :  { %s3221_s21 = smov [#allocation11]   ;;  %s3222_s23 = smov [#allocation2]  }
  0x1a   :  { %s84_s22 = sshll.u32 %s3221_s21, 4  ;;  %s24_s24 = sshll.u32 %s3222_s23, 4  ;;  %s85_s22 = int_to_ptr.vmem [resolvable:$true] %s84_s22  ;;  %s25_s24 = int_to_ptr.vmem [resolvable:$true] %s24_s24 }
  0x1b   :  { %s3095_s1 = scalar_lea.vmem %s85_s22, 512  ;;  %p3100_p11 = scmp.lt.s32.totalorder %s85_s22, %s85_s22 }
  0x1c   :  { %p3096_p10 = scmp.ne.s32.totalorder %s85_s22, %s3095_s1  ;;  %p3101_p12 = scmp.lt.s32.totalorder %s3095_s1, %s3095_s1 }
  0x1e   :  { %p3102_p13 = por %p3101_p12, %p3100_p11 }
  0x20   :  { %p3103_p0 = pnand %p3102_p13, %p3096_p10 }
  0x22   :  { %3106 = shalt.err (!%p3103_p0)
}
  0x23   :  { %90 = dma.hbm_to_vmem [thread:$0]  %s3786_s5, 512, %s85_s22, [#allocation12], %s3219_s14, %s3219_s14, %s3220_s15  }
  0x24   :  { %s3115_s3 = scalar_lea.vmem %s25_s24, 1024  ;;  %p3120_p2 = scmp.lt.s32.totalorder %s25_s24, %s25_s24 }
  0x25   :  { %p3116_p1 = scmp.ne.s32.totalorder %s25_s24, %s3115_s3  ;;  %p3121_p3 = scmp.lt.s32.totalorder %s3115_s3, %s3115_s3 }
  0x27   :  { %p3122_p4 = por %p3121_p3, %p3120_p2 }
  0x29   :  { %p3123_p5 = pnand %p3122_p4, %p3116_p1 }
  0x2b   :  { %3126 = shalt.err (!%p3123_p5)
}
  0x2c   :  { %30 = dma.hbm_to_vmem [thread:$0]  %s3781_s0, 1024, %s25_s24, [#allocation3], %s3219_s14, %s3219_s14, %s3220_s15  }
  0x2d   :  { %s3223_s29 = smov [#allocation7]   ;;  %s3224_s10 = smov [#allocation10]  }
  0x2e   :  { %s48_s30 = sshll.u32 %s3223_s29, 4  ;;  %s72_s11 = sshll.u32 %s3224_s10, 4  ;;  %s49_s30 = int_to_ptr.vmem [resolvable:$true] %s48_s30  ;;  %s73_s11 = int_to_ptr.vmem [resolvable:$true] %s72_s11 }
  0x2f   :  { %s3135_s5 = scalar_lea.vmem %s49_s30, 256  ;;  %p3140_p7 = scmp.lt.s32.totalorder %s49_s30, %s49_s30 }
  0x30   :  { %p3136_p6 = scmp.ne.s32.totalorder %s49_s30, %s3135_s5  ;;  %p3141_p8 = scmp.lt.s32.totalorder %s3135_s5, %s3135_s5 }
  0x32   :  { %p3142_p9 = por %p3141_p8, %p3140_p7 }
  0x34   :  { %p3143_p10 = pnand %p3142_p9, %p3136_p6 }
  0x36   :  { %3146 = shalt.err (!%p3143_p10)
}
  0x37   :  { %54 = dma.hbm_to_vmem [thread:$0]  %s3783_s2, 256, %s49_s30, [#allocation6], %s3219_s14, %s3219_s14, %s3220_s15  }
  0x38   :  { %s3155_s0 = scalar_lea.vmem %s73_s11, 512  ;;  %p3160_p12 = scmp.lt.s32.totalorder %s73_s11, %s73_s11 }
  0x39   :  { %p3156_p11 = scmp.ne.s32.totalorder %s73_s11, %s3155_s0  ;;  %p3161_p13 = scmp.lt.s32.totalorder %s3155_s0, %s3155_s0 }
  0x3b   :  { %p3162_p0 = por %p3161_p13, %p3160_p12 }
  0x3d   :  { %p3163_p1 = pnand %p3162_p0, %p3156_p11 }
  0x3f   :  { %3166 = shalt.err (!%p3163_p1)
}
  0x40   :  { %78 = dma.hbm_to_vmem [thread:$0]  %s3785_s4, 512, %s73_s11, [#allocation9], %s3219_s14, %s3219_s14, %s3220_s15  }
  0x41   :  { %s3225_s18 = smov [#allocation13]  }
  0x42   :  { %s96_s19 = sshll.u32 %s3225_s18, 4  ;;  %s97_s19 = int_to_ptr.vmem [resolvable:$true] %s96_s19 }
  0x43   :  { %s3175_s20 = scalar_lea.vmem %s97_s19, 512  ;;  %p3180_p3 = scmp.lt.s32.totalorder %s97_s19, %s97_s19 }
  0x44   :  { %p3176_p2 = scmp.ne.s32.totalorder %s97_s19, %s3175_s20  ;;  %p3181_p4 = scmp.lt.s32.totalorder %s3175_s20, %s3175_s20 }
  0x46   :  { %p3182_p5 = por %p3181_p4, %p3180_p3 }
  0x48   :  { %p3183_p6 = pnand %p3182_p5, %p3176_p2 }
  0x4a   :  { %3186 = shalt.err (!%p3183_p6)
}
  0x4b   :  { %102 = dma.hbm_to_vmem [thread:$0]  %s3787_s6, 512, %s97_s19, [#allocation12], %s3219_s14, %s3219_s14, %s3220_s15  }
  0x4c   :  { %3207 = dma.done.wait [#allocation3], 1024  }
  0x4d   :  { %3208 = vsyncadd [#allocation3], 4294966272 }
  0x4e   :  { %3209 = dma.done.wait [#allocation6], 512  }
  0x4f   :  { %3210 = vsyncadd [#allocation6], 4294966784 }
  0x50   :  { %3211 = dma.done.wait [#allocation9], 768  }
  0x51   :  { %3212 = vsyncadd [#allocation9], 4294966528 }
  0x52   :  { %3213 = dma.done.wait [#allocation12], 1024  }
  0x53   :  { %3214 = vsyncadd [#allocation12], 4294966272  ;;  %vm132_vm0 = vcmask 261120   ;;  %v3226_v0 = vmov 0.0   ;;  %vm149_vm1 = vcmask 130048   ;;  %v280_v1 = vld [vmem:[#allocation7 + $0x8] sm:$0xff] }
  0x54   :  { %133 = vst.msk [vmem:[#allocation14] sm:$0xff] %vm132_vm0, %v3226_v0  ;;  %v279_v2 = vld [vmem:[#allocation7] sm:$0xff]  ;;  %v3323_v3 = vld [vmem:[#allocation2] sm:$0xff]  ;;  %2659 = vmatprep.subr.mxu1 %v280_v1  ;;  %v3327_v4 = vld [vmem:[#allocation2 + $0x8] sm:$0xff]  ;;  %vm3227_vm2 = vmmov 0  }
  0x55   :  { %2663 = vmatprep.mubr.msk.f32.mxu1 %vm149_vm1, %v3323_v3  ;;  %2660 = vmatpush3.msra.mxu1 %v280_v1  ;;  %v3331_v5 = vld [vmem:[#allocation10 + $0x18] sm:$0xff]  ;;  %v3333_v6 = vld [vmem:[#allocation2 + $0x10] sm:$0xff]  ;;  %v3338_v8 = vld [vmem:[#allocation10 + $0x10] sm:$0xff] }
  0x56   :  { %2647 = vmatprep.mubr.msk.f32.mxu0 %vm149_vm1, %v3323_v3  ;;  %2661 = vmatprep.subr.mxu1 %v279_v2  ;;  %v143_v7 = vld [vmem:[#allocation5 + $0x8] sm:$0xff]  ;;  %v142_v9 = vld [vmem:[#allocation5] sm:$0xff]  ;;  %v3343_v10 = vld [vmem:[#allocation2 + $0x18] sm:$0xff] }
  0x57   :  { %2662 = vmatpush3.msra.mxu1 %v279_v2  ;;  %2643 = vmatprep.subr.mxu0 %v143_v7  ;;  %v3346_v11 = vld [vmem:[#allocation2 + $0x20] sm:$0xff]  ;;  %v3348_v12 = vld [vmem:[#allocation10 + $0x8] sm:$0xff]  ;;  %v3354_v13 = vld [vmem:[#allocation10] sm:$0xff] }
  0x58   :  { %2664 = vmatmul.mubr.msk.f32.vlgmr.msra.gmra.mxu1 %vm149_vm1, %v3327_v4  ;;  %2691 = vmatprep.subr.mxu1 %v3226_v0  ;;  %v139_v14 = vld [vmem:[#allocation2 + $0x28] sm:$0xff]  ;;  %v140_v15 = vld [vmem:[#allocation2 + $0x30] sm:$0xff]  ;;  %v391_v17 = vld [vmem:[#allocation8] sm:$0xff] }
  0x59   :  { %2692 = vmatpush3.msra.mxu1 %v3331_v5  ;;  %2666 = vmatprep.mubr.msk.f32.mxu1 %vm149_vm1, %v3333_v6  ;;  %v392_v16 = vld [vmem:[#allocation8 + $0x8] sm:$0xff]  ;;  %v141_v18 = vld [vmem:[#allocation2 + $0x38] sm:$0xff]  ;;  %v3383_v21 = vld [vmem:[#allocation11 + $0x10] sm:$0xff] }
  0x5a   :  { %2693 = vmatprep.subr.mxu1 %v3226_v0  ;;  %2644 = vmatpush3.msra.mxu0 %v143_v7  ;;  %v3377_v20 = vld [vmem:[#allocation11 + $0x18] sm:$0xff]  ;;  %v3390_v22 = vld [vmem:[#allocation11 + $0x8] sm:$0xff]  ;;  %v3395_v23 = vld [vmem:[#allocation11] sm:$0xff] }
  0x5b   :  { %2694 = vmatpush3.msra.mxu1 %v3338_v8  ;;  %2645 = vmatprep.subr.mxu0 %v142_v9  ;;  %v3375_v19 = vld [vmem:[#allocation14] sm:$0xff]  ;;  %v3400_v24 = vld [vmem:[#allocation13 + $0x18] sm:$0xff]  ;;  %v3406_v25 = vld [vmem:[#allocation13 + $0x10] sm:$0xff] }
  0x5c   :  { %2667 = vmatmul.mubr.msk.f32.gmra.mxu1 %vm149_vm1, %v3343_v10  ;;  %2695 = vmatprep.subr.mxu1 %v3226_v0  ;;  %v3414_v26 = vld [vmem:[#allocation13 + $0x8] sm:$0xff]  ;;  %v3421_v27 = vld [vmem:[#allocation13] sm:$0xff]  ;;  %v2432_v28 = vld [vmem:[%s3788_s7 + $0x1] ss:$0 sm:$0xff] }
  0x5d   :  { %2669 = vmatprep.mubr.msk.f32.mxu1 %vm149_vm1, %v3346_v11  ;;  %2696 = vmatpush3.msra.mxu1 %v3348_v12  ;;  %v2423_v34 = vld [vmem:[%s3788_s7] ss:$0 sm:$0xff] }
  0x5e   :  { %2646 = vmatpush3.msra.mxu0 %v142_v9  ;;  %2697 = vmatprep.subr.mxu1 %v3226_v0  ;;  %v3481_v50 = vld [vmem:[%s3789_s8] ss:$0 sm:$0xff] }
  0x5f   :  { %2648 = vmatmul.mubr.msk.f32.vlgmr.msra.gmra.mxu0 %vm149_vm1, %v3327_v4  ;;  %2698 = vmatpush3.msra.mxu1 %v3354_v13 }
  0x60   :  { %2670 = vmatmul.mubr.msk.f32.gmra.mxu1 %vm149_vm1, %v139_v14  ;;  %2702 = vmatprep.subr.mxu1 %v3226_v0 }
  0x61   :  { %2672 = vmatprep.mubr.msk.f32.mxu1 %vm149_vm1, %v140_v15  ;;  %2675 = vmatprep.subr.mxu0 %v392_v16 }
  0x62   :  { %2676 = vmatpush3.msra.mxu0 %v392_v16  ;;  %2650 = vmatprep.mubr.msk.f32.mxu0 %vm149_vm1, %v3333_v6 }
  0x63   :  { %2651 = vmatmul.mubr.msk.f32.gmra.mxu0 %vm149_vm1, %v3343_v10  ;;  %2677 = vmatprep.subr.mxu0 %v391_v17 }
  0x64   :  { %2673 = vmatmul.mubr.msk.f32.gmra.mxu1 %vm149_vm1, %v141_v18  ;;  %2653 = vmatprep.mubr.msk.f32.mxu0 %vm149_vm1, %v3346_v11 }
  0x65   :  { %2699 = vmatprep.mubr.msk.f32.mxu1 %vm3227_vm2, %v3226_v0  ;;  %2678 = vmatpush3.msra.mxu0 %v391_v17 }
  0x66   :  { %2713 = vmatprep.subr.mxu0 %v3226_v0 }
  0x67   :  { %2654 = vmatmul.mubr.msk.f32.gmra.mxu0 %vm149_vm1, %v139_v14 }
  0x68   :  { %2700 = vmatmul.mubr.msk.f32.vlgmr.msra.gmra.mxu1 %vm132_vm0, %v3375_v19  ;;  %2656 = vmatprep.mubr.msk.f32.mxu0 %vm149_vm1, %v140_v15 }
  0x69   :  { %2703 = vmatpush3.msra.mxu1 %v3377_v20  ;;  %2710 = vmatprep.mubr.msk.f32.mxu1 %vm3227_vm2, %v3226_v0 }
  0x6a   :  { %2704 = vmatprep.subr.mxu1 %v3226_v0 }
  0x6b   :  { %2705 = vmatpush3.msra.mxu1 %v3383_v21  ;;  %2657 = vmatmul.mubr.msk.f32.gmra.mxu0 %vm149_vm1, %v141_v18 }
  0x6c   :  { %2706 = vmatprep.subr.mxu1 %v3226_v0  ;;  %2679 = vmatprep.mubr.msk.f32.mxu0 %vm149_vm1, %v3323_v3  ;;  %v2441_v3 = vld [vmem:[%s3788_s7 + $0x2] ss:$0 sm:$0xff] }
  0x6d   :  { %2707 = vmatpush3.msra.mxu1 %v3390_v22 }
  0x6e   :  { %2708 = vmatprep.subr.mxu1 %v3226_v0 }
  0x6f   :  { %2709 = vmatpush3.msra.mxu1 %v3395_v23  ;;  %2680 = vmatmul.mubr.msk.f32.vlgmr.msra.gmra.mxu0 %vm149_vm1, %v3327_v4  ;;  %v3500_v4 = vld [vmem:[%s3789_s8 + $0x1] ss:$0 sm:$0xff] }
  0x70   :  { %2711 = vmatmul.mubr.msk.f32.vlgmr.msra.gmra.mxu1 %vm132_vm0, %v3375_v19  ;;  %2714 = vmatpush3.msra.mxu0 %v3400_v24 }
  0x71   :  { %2682 = vmatprep.mubr.msk.f32.mxu0 %vm149_vm1, %v3333_v6  ;;  %2715 = vmatprep.subr.mxu0 %v3226_v0 }
  0x72   :  { %2716 = vmatpush3.msra.mxu0 %v3406_v25  ;;  %2724 = vmatprep.subr.mxu1 %v3226_v0 }
  0x73   :  { %2683 = vmatmul.mubr.msk.f32.gmra.mxu0 %vm149_vm1, %v3343_v10  ;;  %2717 = vmatprep.subr.mxu0 %v3226_v0 }
  0x74   :  { %2685 = vmatprep.mubr.msk.f32.mxu0 %vm149_vm1, %v3346_v11  ;;  %2718 = vmatpush3.msra.mxu0 %v3414_v26 }
  0x75   :  { %2719 = vmatprep.subr.mxu0 %v3226_v0  ;;  %2725 = vmatpush3.msra.mxu1 %v3331_v5 }
  0x76   :  { %2720 = vmatpush3.msra.mxu0 %v3421_v27  ;;  %2726 = vmatprep.subr.mxu1 %v3226_v0 }
  0x77   :  { %2686 = vmatmul.mubr.msk.f32.gmra.mxu0 %vm149_vm1, %v139_v14  ;;  %2735 = vmatprep.subr.mxu0 %v3226_v0 }
  0x78   :  { %2688 = vmatprep.mubr.msk.f32.mxu0 %vm149_vm1, %v140_v15  ;;  %2727 = vmatpush3.msra.mxu1 %v3338_v8 }
  0x79   :  { %2728 = vmatprep.subr.mxu1 %v3226_v0  ;;  %2732 = vmatprep.mubr.msk.f32.mxu1 %vm3227_vm2, %v3226_v0 }
  0x7a   :  { %2729 = vmatpush3.msra.mxu1 %v3348_v12 }
  0x7b   :  { %2689 = vmatmul.mubr.msk.f32.gmra.mxu0 %vm149_vm1, %v141_v18  ;;  %2730 = vmatprep.subr.mxu1 %v3226_v0 }
  0x7c   :  { %2721 = vmatprep.mubr.msk.f32.mxu0 %vm3227_vm2, %v3226_v0  ;;  %2731 = vmatpush3.msra.mxu1 %v3354_v13 }
  0x7d   :  { %2746 = vmatprep.subr.mxu1 %v3226_v0 }
  0x7f   :  { %2722 = vmatmul.mubr.msk.f32.vlgmr.msra.gmra.mxu0 %vm132_vm0, %v3375_v19 }
  0x80   :  { %2736 = vmatpush3.msra.mxu0 %v3377_v20  ;;  %2743 = vmatprep.mubr.msk.f32.mxu0 %vm3227_vm2, %v3226_v0 }
  0x81   :  { %2737 = vmatprep.subr.mxu0 %v3226_v0 }
  0x82   :  { %2738 = vmatpush3.msra.mxu0 %v3383_v21 }
  0x83   :  { %2739 = vmatprep.subr.mxu0 %v3226_v0 }
  0x84   :  { %2740 = vmatpush3.msra.mxu0 %v3390_v22 }
  0x85   :  { %2741 = vmatprep.subr.mxu0 %v3226_v0 }
  0x86   :  { %2742 = vmatpush3.msra.mxu0 %v3395_v23 }
  0x87   :  { %2757 = vmatprep.subr.mxu0 %v3226_v0 }
 0x118   :  { %v2665_v29 = vpop.f32.mrf.mxu1 }
 0x119   :  { %v3459_v30 = vadd.f32 %v2665_v29, %v2432_v28 }
 0x11a   :  { %v352_v31 = vpop.f32.mrf.mxu1 }
 0x11b   :  { %v353_v11 = vadd.f32 %v2432_v28, %v352_v31 }
 0x11c   :  { %v2668_v32 = vpop.f32.mrf.mxu1 }
 0x11d   :  { %v3461_v33 = vadd.f32 %v2668_v32, %v2432_v28 }
 0x11e   :  { %v362_v35 = vpop.f32.mrf.mxu1 }
 0x11f   :  { %v3466_v36 = vadd.f32 %v2432_v28, %v362_v35  ;;  %v2649_v37 = vpop.f32.mrf.mxu0 }
 0x120   :  { %v2671_v38 = vpop.f32.mrf.mxu1  ;;  %v3468_v39 = vadd.f32 %v2649_v37, %v2423_v34 }
 0x121   :  { %v3470_v40 = vadd.f32 %v2671_v38, %v2432_v28  ;;  %v240_v41 = vpop.f32.mrf.mxu0 }
 0x122   :  { %v372_v42 = vpop.f32.mrf.mxu1  ;;  %v241_v56 = vadd.f32 %v2423_v34, %v240_v41 }
 0x123   :  { %v3472_v43 = vadd.f32 %v2432_v28, %v372_v42  ;;  %v2652_v44 = vpop.f32.mrf.mxu0 }
 0x124   :  { %v2674_v45 = vpop.f32.mrf.mxu1  ;;  %v3474_v46 = vadd.f32 %v2652_v44, %v2423_v34 }
 0x125   :  { %v3476_v47 = vadd.f32 %v2674_v45, %v2432_v28  ;;  %v250_v48 = vpop.f32.mrf.mxu0 }
 0x126   :  { %v382_v49 = vpop.f32.mrf.mxu1  ;;  %v3483_v51 = vadd.f32 %v2423_v34, %v250_v48 }
 0x127   :  { %v3485_v52 = vadd.f32 %v2432_v28, %v382_v49  ;;  %v2655_v53 = vpop.f32.mrf.mxu0 }
 0x128   :  { %v593_v54 = vpop.f32.mrf.mxu1  ;;  %v3487_v55 = vadd.f32 %v2655_v53, %v2423_v34 }
 0x129   :  { %v594_v57 = vadd.f32 %v3481_v50, %v593_v54  ;;  %v260_v58 = vpop.f32.mrf.mxu0 }
 0x12a   :  { %v2701_v59 = vpop.f32.mrf.mxu1  ;;  %v3490_v60 = vadd.f32 %v2423_v34, %v260_v58 }
 0x12b   :  { %v745_v61 = vadd.f32 %v594_v57, %v241_v56  ;;  %v2658_v62 = vpop.f32.mrf.mxu0  ;;  %v3522_v57 = vld [vmem:[%s3789_s8 + $0x2] ss:$0 sm:$0xff]  ;;  %s3228_s8 = smov [#allocation14]  }
 0x12c   :  { %v3492_v63 = vadd.f32 %v2658_v62, %v2423_v34  ;;  %s2411_s27 = sshll.u32 %s3228_s8, 4  ;;  %s2412_s27 = int_to_ptr.vmem [resolvable:$true] %s2411_s27 }
 0x12d   :  { %v2456_v1 = vmul.f32 -1.442695, %v745_v61  ;;  %v270_v2 = vpop.f32.mrf.mxu0  ;;  %s3187_s28 = scalar_lea.vmem %s2412_s27, 128  ;;  %p3192_p8 = scmp.lt.s32.totalorder %s2412_s27, %s2412_s27 }
 0x12e   :  { %v3502_v6 = vadd.f32 %v2423_v34, %v270_v2  ;;  %p3188_p7 = scmp.ne.s32.totalorder %s2412_s27, %s3187_s28  ;;  %p3193_p9 = scmp.lt.s32.totalorder %s3187_s28, %s3187_s28 }
 0x12f   :  { %2967 = vpow2.f32 %v2456_v1  ;;  %v2681_v7 = vpop.f32.mrf.mxu0 }
 0x130   :  { %v667_v9 = vpop.f32.mrf.mxu1  ;;  %v3504_v10 = vadd.f32 %v2681_v7, %v2441_v3  ;;  %p3194_p10 = por %p3193_p9, %p3192_p8 }
 0x131   :  { %v668_v14 = vadd.f32 %v3500_v4, %v667_v9  ;;  %v464_v15 = vpop.f32.mrf.mxu0 }
 0x132   :  { %v2712_v16 = vpop.f32.mrf.mxu1  ;;  %v465_v62 = vadd.f32 %v2441_v3, %v464_v15  ;;  %p3195_p11 = pnand %p3194_p10, %p3188_p7 }
 0x133   :  { %v752_v17 = vadd.f32 %v668_v14, %v353_v11  ;;  %v2684_v18 = vpop.f32.mrf.mxu0 }
 0x134   :  { %v3507_v29 = vadd.f32 %v2684_v18, %v2441_v3 }
 0x135   :  { %v2457_v32 = vmul.f32 -1.442695, %v752_v17  ;;  %v474_v35 = vpop.f32.mrf.mxu0 }
 0x136   :  { %v3509_v37 = vadd.f32 %v2441_v3, %v474_v35 }
 0x137   :  { %v2687_v34 = vpop.f32.mrf.mxu0  ;;  %2969 = vpow2.f32 %v2457_v32 }
 0x138   :  { %v3511_v38 = vadd.f32 %v2687_v34, %v2441_v3 }
 0x139   :  { %v484_v41 = vpop.f32.mrf.mxu0 }
 0x13a   :  { %v3513_v42 = vadd.f32 %v2441_v3, %v484_v41 }
 0x13b   :  { %v2690_v28 = vpop.f32.mrf.mxu0 }
 0x13c   :  { %v2968_v31 = vpop.eup %2967  ;;  %v3515_v44 = vadd.f32 %v2690_v28, %v2441_v3 }
 0x13d   :  { %v749_v45 = vadd.f32 1.0, %v2968_v31  ;;  %v494_v48 = vpop.f32.mrf.mxu0 }
 0x13e   :  { %v3517_v49 = vadd.f32 %v2441_v3, %v494_v48 }
 0x13f   :  { %2971 = vrcp.f32 %v749_v45  ;;  %v741_v53 = vpop.f32.mrf.mxu0 }
 0x140   :  { %v742_v59 = vadd.f32 %v3522_v57, %v741_v53 }
 0x141   :  { %v2723_v54 = vpop.f32.mrf.mxu0 }
 0x144   :  { %v2970_v56 = vpop.eup %2969 }
 0x145   :  { %v756_v58 = vadd.f32 1.0, %v2970_v56 }
 0x147   :  { %2973 = vrcp.f32 %v756_v58 }
 0x14c   :  { %v2972_v61 = vpop.eup %2971 }
 0x14d   :  { %v759_v1 = vmul.f32 %v2972_v61, %v742_v59 }
 0x14f   :  { %v760_v2 = vadd.f32 %v759_v1, %v465_v62 }
 0x151   :  { %2975 = vtanh.f32 %v760_v2 }
 0x154   :  { %v2974_v7 = vpop.eup %2973 }
 0x155   :  { %v762_v9 = vsub.f32 1.0, %v2974_v7  ;;  %v764_v16 = vmul.f32 %v2974_v7, %v3375_v19 }
 0x15e   :  { %v2976_v11 = vpop.eup %2975 }
 0x15f   :  { %v763_v14 = vmul.f32 %v2976_v11, %v762_v9 }
 0x161   :  { %v765_v17 = vadd.f32 %v764_v16, %v763_v14 }
 0x163   :  { %2733 = vmatmul.mubr.msk.f32.vlgmr.msra.gmra.mxu1 %vm132_vm0, %v765_v17  ;;  %2744 = vmatmul.mubr.msk.f32.vlgmr.msra.gmra.mxu0 %vm132_vm0, %v765_v17 }
 0x164   :  { %2747 = vmatpush3.msra.mxu1 %v3400_v24  ;;  %2754 = vmatprep.mubr.msk.f32.mxu1 %vm3227_vm2, %v3226_v0 }
 0x165   :  { %2748 = vmatprep.subr.mxu1 %v3226_v0  ;;  %2758 = vmatpush3.msra.mxu0 %v3331_v5 }
 0x166   :  { %2749 = vmatpush3.msra.mxu1 %v3406_v25  ;;  %2759 = vmatprep.subr.mxu0 %v3226_v0 }
 0x167   :  { %2750 = vmatprep.subr.mxu1 %v3226_v0  ;;  %2760 = vmatpush3.msra.mxu0 %v3338_v8 }
 0x168   :  { %2751 = vmatpush3.msra.mxu1 %v3414_v26  ;;  %2761 = vmatprep.subr.mxu0 %v3226_v0 }
 0x169   :  { %2752 = vmatprep.subr.mxu1 %v3226_v0  ;;  %2762 = vmatpush3.msra.mxu0 %v3348_v12 }
 0x16a   :  { %2753 = vmatpush3.msra.mxu1 %v3421_v27  ;;  %2763 = vmatprep.subr.mxu0 %v3226_v0 }
 0x16b   :  { %2755 = vmatmul.mubr.msk.f32.vlgmr.msra.gmra.mxu1 %vm132_vm0, %v765_v17  ;;  %2768 = vmatprep.subr.mxu1 %v3226_v0 }
 0x16c   :  { %2769 = vmatpush3.msra.mxu1 %v3377_v20  ;;  %2764 = vmatpush3.msra.mxu0 %v3354_v13 }
 0x16d   :  { %2770 = vmatprep.subr.mxu1 %v3226_v0  ;;  %2765 = vmatprep.mubr.msk.f32.mxu0 %vm3227_vm2, %v3226_v0 }
 0x16e   :  { %2771 = vmatpush3.msra.mxu1 %v3383_v21  ;;  %2776 = vmatprep.mubr.msk.f32.mxu1 %vm3227_vm2, %v3226_v0 }
 0x16f   :  { %2772 = vmatprep.subr.mxu1 %v3226_v0  ;;  %2779 = vmatprep.subr.mxu0 %v3226_v0 }
 0x170   :  { %2773 = vmatpush3.msra.mxu1 %v3390_v22 }
 0x171   :  { %2774 = vmatprep.subr.mxu1 %v3226_v0 }
 0x172   :  { %2775 = vmatpush3.msra.mxu1 %v3395_v23 }
 0x173   :  { %2790 = vmatprep.subr.mxu1 %v3226_v0 }
 0x223   :  { %v835_v19 = vpop.f32.mrf.mxu1  ;;  %v905_v3 = vpop.f32.mrf.mxu0 }
 0x224   :  { %v836_v15 = vadd.f32 %v3481_v50, %v835_v19  ;;  %v906_v41 = vadd.f32 %v3500_v4, %v905_v3 }
 0x225   :  { %v2734_v18 = vpop.f32.mrf.mxu1  ;;  %v2745_v32 = vpop.f32.mrf.mxu0 }
 0x226   :  { %v979_v35 = vadd.f32 %v836_v15, %v3468_v39  ;;  %v986_v31 = vadd.f32 %v906_v41, %v3459_v30 }
 0x228   :  { %v2461_v34 = vmul.f32 -1.442695, %v979_v35  ;;  %v2462_v48 = vmul.f32 -1.442695, %v986_v31 }
 0x22a   :  { %2977 = vpow2.f32 %v2461_v34 }
 0x22b   :  { %v975_v28 = vpop.f32.mrf.mxu1  ;;  %2979 = vpow2.f32 %v2462_v48 }
 0x22c   :  { %v976_v59 = vadd.f32 %v3522_v57, %v975_v28 }
 0x22d   :  { %v2756_v45 = vpop.f32.mrf.mxu1 }
 0x237   :  { %v2978_v53 = vpop.eup %2977 }
 0x238   :  { %v983_v54 = vadd.f32 1.0, %v2978_v53  ;;  %v2980_v56 = vpop.eup %2979 }
 0x239   :  { %v990_v58 = vadd.f32 1.0, %v2980_v56 }
 0x23a   :  { %2981 = vrcp.f32 %v983_v54 }
 0x23b   :  { %2983 = vrcp.f32 %v990_v58 }
 0x247   :  { %v2982_v61 = vpop.eup %2981 }
 0x248   :  { %v993_v39 = vmul.f32 %v2982_v61, %v976_v59  ;;  %v2984_v1 = vpop.eup %2983 }
 0x249   :  { %v996_v2 = vsub.f32 1.0, %v2984_v1  ;;  %v998_v9 = vmul.f32 %v2984_v1, %v765_v17 }
 0x24a   :  { %v994_v62 = vadd.f32 %v993_v39, %v3504_v10 }
 0x24c   :  { %2985 = vtanh.f32 %v994_v62 }
 0x259   :  { %v2986_v7 = vpop.eup %2985 }
 0x25a   :  { %v997_v30 = vmul.f32 %v2986_v7, %v996_v2 }
 0x25c   :  { %v999_v11 = vadd.f32 %v998_v9, %v997_v30 }
 0x25e   :  { %2766 = vmatmul.mubr.msk.f32.vlgmr.msra.gmra.mxu0 %vm132_vm0, %v999_v11  ;;  %2777 = vmatmul.mubr.msk.f32.vlgmr.msra.gmra.mxu1 %vm132_vm0, %v999_v11 }
 0x25f   :  { %2780 = vmatpush3.msra.mxu0 %v3400_v24  ;;  %2787 = vmatprep.mubr.msk.f32.mxu0 %vm3227_vm2, %v3226_v0 }
 0x260   :  { %2781 = vmatprep.subr.mxu0 %v3226_v0  ;;  %2791 = vmatpush3.msra.mxu1 %v3331_v5 }
 0x261   :  { %2782 = vmatpush3.msra.mxu0 %v3406_v25  ;;  %2792 = vmatprep.subr.mxu1 %v3226_v0 }
 0x262   :  { %2783 = vmatprep.subr.mxu0 %v3226_v0  ;;  %2793 = vmatpush3.msra.mxu1 %v3338_v8 }
 0x263   :  { %2784 = vmatpush3.msra.mxu0 %v3414_v26  ;;  %2794 = vmatprep.subr.mxu1 %v3226_v0 }
 0x264   :  { %2785 = vmatprep.subr.mxu0 %v3226_v0  ;;  %2795 = vmatpush3.msra.mxu1 %v3348_v12 }
 0x265   :  { %2786 = vmatpush3.msra.mxu0 %v3421_v27  ;;  %2796 = vmatprep.subr.mxu1 %v3226_v0 }
 0x266   :  { %2788 = vmatmul.mubr.msk.f32.vlgmr.msra.gmra.mxu0 %vm132_vm0, %v999_v11  ;;  %2801 = vmatprep.subr.mxu0 %v3226_v0 }
 0x267   :  { %2802 = vmatpush3.msra.mxu0 %v3377_v20  ;;  %2797 = vmatpush3.msra.mxu1 %v3354_v13 }
 0x268   :  { %2803 = vmatprep.subr.mxu0 %v3226_v0  ;;  %2798 = vmatprep.mubr.msk.f32.mxu1 %vm3227_vm2, %v3226_v0 }
 0x269   :  { %2804 = vmatpush3.msra.mxu0 %v3383_v21  ;;  %2809 = vmatprep.mubr.msk.f32.mxu0 %vm3227_vm2, %v3226_v0 }
 0x26a   :  { %2805 = vmatprep.subr.mxu0 %v3226_v0  ;;  %2812 = vmatprep.subr.mxu1 %v3226_v0 }
 0x26b   :  { %2806 = vmatpush3.msra.mxu0 %v3390_v22 }
 0x26c   :  { %2807 = vmatprep.subr.mxu0 %v3226_v0 }
 0x26d   :  { %2808 = vmatpush3.msra.mxu0 %v3395_v23 }
 0x26e   :  { %2823 = vmatprep.subr.mxu0 %v3226_v0 }
 0x31e   :  { %v1069_v10 = vpop.f32.mrf.mxu0  ;;  %v1139_v14 = vpop.f32.mrf.mxu1 }
 0x31f   :  { %v1070_v16 = vadd.f32 %v3481_v50, %v1069_v10  ;;  %v1140_v18 = vadd.f32 %v3500_v4, %v1139_v14 }
 0x320   :  { %v2767_v17 = vpop.f32.mrf.mxu0  ;;  %v2778_v19 = vpop.f32.mrf.mxu1 }
 0x321   :  { %v1213_v3 = vadd.f32 %v1070_v16, %v3483_v51  ;;  %v1220_v35 = vadd.f32 %v1140_v18, %v3466_v36 }
 0x323   :  { %v2466_v15 = vmul.f32 -1.442695, %v1213_v3  ;;  %v2467_v41 = vmul.f32 -1.442695, %v1220_v35 }
 0x325   :  { %2987 = vpow2.f32 %v2466_v15 }
 0x326   :  { %v1209_v32 = vpop.f32.mrf.mxu0  ;;  %2989 = vpow2.f32 %v2467_v41 }
 0x327   :  { %v1210_v53 = vadd.f32 %v3522_v57, %v1209_v32 }
 0x328   :  { %v2789_v34 = vpop.f32.mrf.mxu0 }
 0x332   :  { %v2988_v28 = vpop.eup %2987 }
 0x333   :  { %v1217_v31 = vadd.f32 1.0, %v2988_v28  ;;  %v2990_v45 = vpop.eup %2989 }
 0x334   :  { %v1224_v48 = vadd.f32 1.0, %v2990_v45 }
 0x335   :  { %2991 = vrcp.f32 %v1217_v31 }
 0x336   :  { %2993 = vrcp.f32 %v1224_v48 }
 0x342   :  { %v2992_v54 = vpop.eup %2991 }
 0x343   :  { %v1227_v51 = vmul.f32 %v2992_v54, %v1210_v53  ;;  %v2994_v58 = vpop.eup %2993 }
 0x344   :  { %v1230_v59 = vsub.f32 1.0, %v2994_v58  ;;  %v1232_v39 = vmul.f32 %v2994_v58, %v999_v11 }
 0x345   :  { %v1228_v56 = vadd.f32 %v1227_v51, %v3509_v37 }
 0x347   :  { %2995 = vtanh.f32 %v1228_v56 }
 0x354   :  { %v2996_v61 = vpop.eup %2995 }
 0x355   :  { %v1231_v36 = vmul.f32 %v2996_v61, %v1230_v59 }
 0x357   :  { %v1233_v62 = vadd.f32 %v1232_v39, %v1231_v36 }
 0x359   :  { %2799 = vmatmul.mubr.msk.f32.vlgmr.msra.gmra.mxu1 %vm132_vm0, %v1233_v62  ;;  %2810 = vmatmul.mubr.msk.f32.vlgmr.msra.gmra.mxu0 %vm132_vm0, %v1233_v62 }
 0x35a   :  { %2813 = vmatpush3.msra.mxu1 %v3400_v24  ;;  %2820 = vmatprep.mubr.msk.f32.mxu1 %vm3227_vm2, %v3226_v0 }
 0x35b   :  { %2814 = vmatprep.subr.mxu1 %v3226_v0  ;;  %2824 = vmatpush3.msra.mxu0 %v3331_v5 }
 0x35c   :  { %2815 = vmatpush3.msra.mxu1 %v3406_v25  ;;  %2825 = vmatprep.subr.mxu0 %v3226_v0 }
 0x35d   :  { %2816 = vmatprep.subr.mxu1 %v3226_v0  ;;  %2826 = vmatpush3.msra.mxu0 %v3338_v8 }
 0x35e   :  { %2817 = vmatpush3.msra.mxu1 %v3414_v26  ;;  %2827 = vmatprep.subr.mxu0 %v3226_v0 }
 0x35f   :  { %2818 = vmatprep.subr.mxu1 %v3226_v0  ;;  %2828 = vmatpush3.msra.mxu0 %v3348_v12 }
 0x360   :  { %2819 = vmatpush3.msra.mxu1 %v3421_v27  ;;  %2829 = vmatprep.subr.mxu0 %v3226_v0 }
 0x361   :  { %2821 = vmatmul.mubr.msk.f32.vlgmr.msra.gmra.mxu1 %vm132_vm0, %v1233_v62  ;;  %2834 = vmatprep.subr.mxu1 %v3226_v0 }
 0x362   :  { %2835 = vmatpush3.msra.mxu1 %v3377_v20  ;;  %2830 = vmatpush3.msra.mxu0 %v3354_v13 }
 0x363   :  { %2836 = vmatprep.subr.mxu1 %v3226_v0  ;;  %2831 = vmatprep.mubr.msk.f32.mxu0 %vm3227_vm2, %v3226_v0 }
 0x364   :  { %2837 = vmatpush3.msra.mxu1 %v3383_v21  ;;  %2842 = vmatprep.mubr.msk.f32.mxu1 %vm3227_vm2, %v3226_v0 }
 0x365   :  { %2838 = vmatprep.subr.mxu1 %v3226_v0  ;;  %2845 = vmatprep.subr.mxu0 %v3226_v0 }
 0x366   :  { %2839 = vmatpush3.msra.mxu1 %v3390_v22 }
 0x367   :  { %2840 = vmatprep.subr.mxu1 %v3226_v0 }
 0x368   :  { %2841 = vmatpush3.msra.mxu1 %v3395_v23 }
 0x369   :  { %2856 = vmatprep.subr.mxu1 %v3226_v0 }
 0x419   :  { %v1303_v37 = vpop.f32.mrf.mxu1  ;;  %v1373_v1 = vpop.f32.mrf.mxu0 }
 0x41a   :  { %v1304_v2 = vadd.f32 %v3481_v50, %v1303_v37  ;;  %v1374_v10 = vadd.f32 %v3500_v4, %v1373_v1 }
 0x41b   :  { %v2800_v7 = vpop.f32.mrf.mxu1  ;;  %v2811_v30 = vpop.f32.mrf.mxu0 }
 0x41c   :  { %v1447_v9 = vadd.f32 %v1304_v2, %v3474_v46  ;;  %v1454_v16 = vadd.f32 %v1374_v10, %v3461_v33 }
 0x41e   :  { %v2471_v11 = vmul.f32 -1.442695, %v1447_v9  ;;  %v2472_v19 = vmul.f32 -1.442695, %v1454_v16 }
 0x420   :  { %2997 = vpow2.f32 %v2471_v11 }
 0x421   :  { %v1443_v14 = vpop.f32.mrf.mxu1  ;;  %2999 = vpow2.f32 %v2472_v19 }
 0x422   :  { %v1444_v35 = vadd.f32 %v3522_v57, %v1443_v14 }
 0x423   :  { %v2822_v17 = vpop.f32.mrf.mxu1 }
 0x42d   :  { %v2998_v3 = vpop.eup %2997 }
 0x42e   :  { %v1451_v15 = vadd.f32 1.0, %v2998_v3  ;;  %v3000_v18 = vpop.eup %2999 }
 0x42f   :  { %v1458_v32 = vadd.f32 1.0, %v3000_v18 }
 0x430   :  { %3001 = vrcp.f32 %v1451_v15 }
 0x431   :  { %3003 = vrcp.f32 %v1458_v32 }
 0x43d   :  { %v3002_v34 = vpop.eup %3001 }
 0x43e   :  { %v1461_v46 = vmul.f32 %v3002_v34, %v1444_v35  ;;  %v3004_v28 = vpop.eup %3003 }
 0x43f   :  { %v1464_v31 = vsub.f32 1.0, %v3004_v28  ;;  %v1466_v48 = vmul.f32 %v3004_v28, %v1233_v62 }
 0x440   :  { %v1462_v41 = vadd.f32 %v1461_v46, %v3507_v29 }
 0x442   :  { %3005 = vtanh.f32 %v1462_v41 }
 0x44f   :  { %v3006_v45 = vpop.eup %3005 }
 0x450   :  { %v1465_v33 = vmul.f32 %v3006_v45, %v1464_v31 }
 0x452   :  { %v1467_v53 = vadd.f32 %v1466_v48, %v1465_v33 }
 0x454   :  { %2832 = vmatmul.mubr.msk.f32.vlgmr.msra.gmra.mxu0 %vm132_vm0, %v1467_v53  ;;  %2843 = vmatmul.mubr.msk.f32.vlgmr.msra.gmra.mxu1 %vm132_vm0, %v1467_v53 }
 0x455   :  { %2846 = vmatpush3.msra.mxu0 %v3400_v24  ;;  %2853 = vmatprep.mubr.msk.f32.mxu0 %vm3227_vm2, %v3226_v0 }
 0x456   :  { %2847 = vmatprep.subr.mxu0 %v3226_v0  ;;  %2857 = vmatpush3.msra.mxu1 %v3331_v5 }
 0x457   :  { %2848 = vmatpush3.msra.mxu0 %v3406_v25  ;;  %2858 = vmatprep.subr.mxu1 %v3226_v0 }
 0x458   :  { %2849 = vmatprep.subr.mxu0 %v3226_v0  ;;  %2859 = vmatpush3.msra.mxu1 %v3338_v8 }
 0x459   :  { %2850 = vmatpush3.msra.mxu0 %v3414_v26  ;;  %2860 = vmatprep.subr.mxu1 %v3226_v0 }
 0x45a   :  { %2851 = vmatprep.subr.mxu0 %v3226_v0  ;;  %2861 = vmatpush3.msra.mxu1 %v3348_v12 }
 0x45b   :  { %2852 = vmatpush3.msra.mxu0 %v3421_v27  ;;  %2862 = vmatprep.subr.mxu1 %v3226_v0 }
 0x45c   :  { %2854 = vmatmul.mubr.msk.f32.vlgmr.msra.gmra.mxu0 %vm132_vm0, %v1467_v53  ;;  %2867 = vmatprep.subr.mxu0 %v3226_v0 }
 0x45d   :  { %2868 = vmatpush3.msra.mxu0 %v3377_v20  ;;  %2863 = vmatpush3.msra.mxu1 %v3354_v13 }
 0x45e   :  { %2869 = vmatprep.subr.mxu0 %v3226_v0  ;;  %2864 = vmatprep.mubr.msk.f32.mxu1 %vm3227_vm2, %v3226_v0 }
 0x45f   :  { %2870 = vmatpush3.msra.mxu0 %v3383_v21  ;;  %2875 = vmatprep.mubr.msk.f32.mxu0 %vm3227_vm2, %v3226_v0 }
 0x460   :  { %2871 = vmatprep.subr.mxu0 %v3226_v0  ;;  %2878 = vmatprep.subr.mxu1 %v3226_v0 }
 0x461   :  { %2872 = vmatpush3.msra.mxu0 %v3390_v22 }
 0x462   :  { %2873 = vmatprep.subr.mxu0 %v3226_v0 }
 0x463   :  { %2874 = vmatpush3.msra.mxu0 %v3395_v23 }
 0x464   :  { %2889 = vmatprep.subr.mxu0 %v3226_v0 }
 0x514   :  { %v1537_v29 = vpop.f32.mrf.mxu0  ;;  %v1607_v54 = vpop.f32.mrf.mxu1 }
 0x515   :  { %v1538_v51 = vadd.f32 %v3481_v50, %v1537_v29  ;;  %v1608_v36 = vadd.f32 %v3500_v4, %v1607_v54 }
 0x516   :  { %v2833_v56 = vpop.f32.mrf.mxu0  ;;  %v2844_v58 = vpop.f32.mrf.mxu1 }
 0x517   :  { %v1681_v59 = vadd.f32 %v1538_v51, %v3490_v60  ;;  %v1688_v62 = vadd.f32 %v1608_v36, %v3472_v43 }
 0x519   :  { %v2476_v61 = vmul.f32 -1.442695, %v1681_v59  ;;  %v2477_v1 = vmul.f32 -1.442695, %v1688_v62 }
 0x51b   :  { %3007 = vpow2.f32 %v2476_v61 }
 0x51c   :  { %v1677_v39 = vpop.f32.mrf.mxu0  ;;  %3009 = vpow2.f32 %v2477_v1 }
 0x51d   :  { %v1678_v11 = vadd.f32 %v3522_v57, %v1677_v39 }
 0x51e   :  { %v2855_v37 = vpop.f32.mrf.mxu0 }
 0x528   :  { %v3008_v2 = vpop.eup %3007 }
 0x529   :  { %v1685_v7 = vadd.f32 1.0, %v3008_v2  ;;  %v3010_v30 = vpop.eup %3009 }
 0x52a   :  { %v1692_v9 = vadd.f32 1.0, %v3010_v30 }
 0x52b   :  { %3011 = vrcp.f32 %v1685_v7 }
 0x52c   :  { %3013 = vrcp.f32 %v1692_v9 }
 0x538   :  { %v3012_v10 = vpop.eup %3011 }
 0x539   :  { %v1695_v60 = vmul.f32 %v3012_v10, %v1678_v11  ;;  %v3014_v16 = vpop.eup %3013 }
 0x53a   :  { %v1698_v17 = vsub.f32 1.0, %v3014_v16  ;;  %v1700_v3 = vmul.f32 %v3014_v16, %v1467_v53 }
 0x53b   :  { %v1696_v14 = vadd.f32 %v1695_v60, %v3513_v42 }
 0x53d   :  { %3015 = vtanh.f32 %v1696_v14 }
 0x54a   :  { %v3016_v19 = vpop.eup %3015 }
 0x54b   :  { %v1699_v43 = vmul.f32 %v3016_v19, %v1698_v17 }
 0x54d   :  { %v1701_v15 = vadd.f32 %v1700_v3, %v1699_v43 }
 0x54f   :  { %2865 = vmatmul.mubr.msk.f32.vlgmr.msra.gmra.mxu1 %vm132_vm0, %v1701_v15  ;;  %2876 = vmatmul.mubr.msk.f32.vlgmr.msra.gmra.mxu0 %vm132_vm0, %v1701_v15 }
 0x550   :  { %2879 = vmatpush3.msra.mxu1 %v3400_v24  ;;  %2886 = vmatprep.mubr.msk.f32.mxu1 %vm3227_vm2, %v3226_v0 }
 0x551   :  { %2880 = vmatprep.subr.mxu1 %v3226_v0  ;;  %2890 = vmatpush3.msra.mxu0 %v3331_v5 }
 0x552   :  { %2881 = vmatpush3.msra.mxu1 %v3406_v25  ;;  %2891 = vmatprep.subr.mxu0 %v3226_v0 }
 0x553   :  { %2882 = vmatprep.subr.mxu1 %v3226_v0  ;;  %2892 = vmatpush3.msra.mxu0 %v3338_v8 }
 0x554   :  { %2883 = vmatpush3.msra.mxu1 %v3414_v26  ;;  %2893 = vmatprep.subr.mxu0 %v3226_v0 }
 0x555   :  { %2884 = vmatprep.subr.mxu1 %v3226_v0  ;;  %2894 = vmatpush3.msra.mxu0 %v3348_v12 }
 0x556   :  { %2885 = vmatpush3.msra.mxu1 %v3421_v27  ;;  %2895 = vmatprep.subr.mxu0 %v3226_v0 }
 0x557   :  { %2887 = vmatmul.mubr.msk.f32.vlgmr.msra.gmra.mxu1 %vm132_vm0, %v1701_v15  ;;  %2900 = vmatprep.subr.mxu1 %v3226_v0 }
 0x558   :  { %2901 = vmatpush3.msra.mxu1 %v3377_v20  ;;  %2896 = vmatpush3.msra.mxu0 %v3354_v13 }
 0x559   :  { %2902 = vmatprep.subr.mxu1 %v3226_v0  ;;  %2897 = vmatprep.mubr.msk.f32.mxu0 %vm3227_vm2, %v3226_v0 }
 0x55a   :  { %2903 = vmatpush3.msra.mxu1 %v3383_v21  ;;  %2908 = vmatprep.mubr.msk.f32.mxu1 %vm3227_vm2, %v3226_v0 }
 0x55b   :  { %2904 = vmatprep.subr.mxu1 %v3226_v0  ;;  %2911 = vmatprep.subr.mxu0 %v3226_v0 }
 0x55c   :  { %2905 = vmatpush3.msra.mxu1 %v3390_v22 }
 0x55d   :  { %2906 = vmatprep.subr.mxu1 %v3226_v0 }
 0x55e   :  { %2907 = vmatpush3.msra.mxu1 %v3395_v23 }
 0x55f   :  { %2922 = vmatprep.subr.mxu1 %v3226_v0 }
 0x60f   :  { %v1771_v42 = vpop.f32.mrf.mxu1  ;;  %v1841_v18 = vpop.f32.mrf.mxu0 }
 0x610   :  { %v1772_v32 = vadd.f32 %v3481_v50, %v1771_v42  ;;  %v1842_v28 = vadd.f32 %v3500_v4, %v1841_v18 }
 0x611   :  { %v2866_v35 = vpop.f32.mrf.mxu1  ;;  %v2877_v34 = vpop.f32.mrf.mxu0 }
 0x612   :  { %v1915_v46 = vadd.f32 %v1772_v32, %v3487_v55  ;;  %v1922_v45 = vadd.f32 %v1842_v28, %v3470_v40 }
 0x614   :  { %v2481_v41 = vmul.f32 -1.442695, %v1915_v46  ;;  %v2482_v48 = vmul.f32 -1.442695, %v1922_v45 }
 0x616   :  { %3017 = vpow2.f32 %v2481_v41 }
 0x617   :  { %v1911_v31 = vpop.f32.mrf.mxu1  ;;  %3019 = vpow2.f32 %v2482_v48 }
 0x618   :  { %v1912_v56 = vadd.f32 %v3522_v57, %v1911_v31 }
 0x619   :  { %v2888_v33 = vpop.f32.mrf.mxu1 }
 0x623   :  { %v3018_v53 = vpop.eup %3017 }
 0x624   :  { %v1919_v29 = vadd.f32 1.0, %v3018_v53  ;;  %v3020_v54 = vpop.eup %3019 }
 0x625   :  { %v1926_v51 = vadd.f32 1.0, %v3020_v54 }
 0x626   :  { %3021 = vrcp.f32 %v1919_v29 }
 0x627   :  { %3023 = vrcp.f32 %v1926_v51 }
 0x633   :  { %v3022_v58 = vpop.eup %3021 }
 0x634   :  { %v1929_v55 = vmul.f32 %v3022_v58, %v1912_v56  ;;  %v3024_v61 = vpop.eup %3023 }
 0x635   :  { %v1932_v36 = vsub.f32 1.0, %v3024_v61  ;;  %v1934_v62 = vmul.f32 %v3024_v61, %v1701_v15 }
 0x636   :  { %v1930_v59 = vadd.f32 %v1929_v55, %v3511_v38 }
 0x638   :  { %3025 = vtanh.f32 %v1930_v59 }
 0x645   :  { %v3026_v39 = vpop.eup %3025 }
 0x646   :  { %v1933_v40 = vmul.f32 %v3026_v39, %v1932_v36 }
 0x648   :  { %v1935_v37 = vadd.f32 %v1934_v62, %v1933_v40 }
 0x64a   :  { %2898 = vmatmul.mubr.msk.f32.vlgmr.msra.gmra.mxu0 %vm132_vm0, %v1935_v37  ;;  %2909 = vmatmul.mubr.msk.f32.vlgmr.msra.gmra.mxu1 %vm132_vm0, %v1935_v37 }
 0x64b   :  { %2912 = vmatpush3.msra.mxu0 %v3400_v24  ;;  %2919 = vmatprep.mubr.msk.f32.mxu0 %vm3227_vm2, %v3226_v0 }
 0x64c   :  { %2913 = vmatprep.subr.mxu0 %v3226_v0  ;;  %2923 = vmatpush3.msra.mxu1 %v3331_v5 }
 0x64d   :  { %2914 = vmatpush3.msra.mxu0 %v3406_v25  ;;  %2924 = vmatprep.subr.mxu1 %v3226_v0 }
 0x64e   :  { %2915 = vmatprep.subr.mxu0 %v3226_v0  ;;  %2925 = vmatpush3.msra.mxu1 %v3338_v8 }
 0x64f   :  { %2916 = vmatpush3.msra.mxu0 %v3414_v26  ;;  %2926 = vmatprep.subr.mxu1 %v3226_v0 }
 0x650   :  { %2917 = vmatprep.subr.mxu0 %v3226_v0  ;;  %2927 = vmatpush3.msra.mxu1 %v3348_v12 }
 0x651   :  { %2918 = vmatpush3.msra.mxu0 %v3421_v27  ;;  %2928 = vmatprep.subr.mxu1 %v3226_v0 }
 0x652   :  { %2920 = vmatmul.mubr.msk.f32.vlgmr.msra.gmra.mxu0 %vm132_vm0, %v1935_v37  ;;  %2933 = vmatprep.subr.mxu0 %v3226_v0 }
 0x653   :  { %2934 = vmatpush3.msra.mxu0 %v3377_v20  ;;  %2929 = vmatpush3.msra.mxu1 %v3354_v13 }
 0x654   :  { %2935 = vmatprep.subr.mxu0 %v3226_v0  ;;  %2930 = vmatprep.mubr.msk.f32.mxu1 %vm3227_vm2, %v3226_v0 }
 0x655   :  { %2936 = vmatpush3.msra.mxu0 %v3383_v21  ;;  %2941 = vmatprep.mubr.msk.f32.mxu0 %vm3227_vm2, %v3226_v0 }
 0x656   :  { %2937 = vmatprep.subr.mxu0 %v3226_v0  ;;  %2944 = vmatprep.subr.mxu1 %v3226_v0 }
 0x657   :  { %2938 = vmatpush3.msra.mxu0 %v3390_v22 }
 0x658   :  { %2939 = vmatprep.subr.mxu0 %v3226_v0 }
 0x659   :  { %2940 = vmatpush3.msra.mxu0 %v3395_v23 }
 0x70a   :  { %v2005_v5 = vpop.f32.mrf.mxu0  ;;  %v2075_v8 = vpop.f32.mrf.mxu1 }
 0x70b   :  { %v2006_v12 = vadd.f32 %v3481_v50, %v2005_v5  ;;  %v2076_v1 = vadd.f32 %v3500_v4, %v2075_v8 }
 0x70c   :  { %v2899_v13 = vpop.f32.mrf.mxu0  ;;  %v2910_v20 = vpop.f32.mrf.mxu1 }
 0x70d   :  { %v2149_v21 = vadd.f32 %v2006_v12, %v3502_v6  ;;  %v2156_v7 = vadd.f32 %v2076_v1, %v3485_v52 }
 0x70f   :  { %v2486_v38 = vmul.f32 -1.442695, %v2149_v21  ;;  %v2487_v30 = vmul.f32 -1.442695, %v2156_v7 }
 0x711   :  { %3027 = vpow2.f32 %v2486_v38 }
 0x712   :  { %v2145_v2 = vpop.f32.mrf.mxu0  ;;  %3029 = vpow2.f32 %v2487_v30 }
 0x713   :  { %v2146_v60 = vadd.f32 %v3522_v57, %v2145_v2 }
 0x714   :  { %v2921_v22 = vpop.f32.mrf.mxu0 }
 0x71e   :  { %v3028_v9 = vpop.eup %3027 }
 0x71f   :  { %v2153_v23 = vadd.f32 1.0, %v3028_v9  ;;  %v3030_v11 = vpop.eup %3029 }
 0x720   :  { %v2160_v10 = vadd.f32 1.0, %v3030_v11 }
 0x721   :  { %3031 = vrcp.f32 %v2153_v23 }
 0x722   :  { %3033 = vrcp.f32 %v2160_v10 }
 0x72e   :  { %v3032_v14 = vpop.eup %3031 }
 0x72f   :  { %v2163_v6 = vmul.f32 %v3032_v14, %v2146_v60  ;;  %v3034_v17 = vpop.eup %3033 }
 0x730   :  { %v2166_v19 = vsub.f32 1.0, %v3034_v17  ;;  %v2168_v3 = vmul.f32 %v3034_v17, %v1935_v37 }
 0x731   :  { %v2164_v16 = vadd.f32 %v2163_v6, %v3517_v49 }
 0x733   :  { %3035 = vtanh.f32 %v2164_v16 }
 0x740   :  { %v3036_v43 = vpop.eup %3035 }
 0x741   :  { %v2167_v52 = vmul.f32 %v3036_v43, %v2166_v19 }
 0x743   :  { %v2169_v15 = vadd.f32 %v2168_v3, %v2167_v52 }
 0x745   :  { %2931 = vmatmul.mubr.msk.f32.vlgmr.msra.gmra.mxu1 %vm132_vm0, %v2169_v15  ;;  %2942 = vmatmul.mubr.msk.f32.vlgmr.msra.gmra.mxu0 %vm132_vm0, %v2169_v15 }
 0x746   :  { %2945 = vmatpush3.msra.mxu1 %v3400_v24  ;;  %2952 = vmatprep.mubr.msk.f32.mxu1 %vm3227_vm2, %v3226_v0 }
 0x747   :  { %2946 = vmatprep.subr.mxu1 %v3226_v0 }
 0x748   :  { %2947 = vmatpush3.msra.mxu1 %v3406_v25 }
 0x749   :  { %2948 = vmatprep.subr.mxu1 %v3226_v0 }
 0x74a   :  { %2949 = vmatpush3.msra.mxu1 %v3414_v26 }
 0x74b   :  { %2950 = vmatprep.subr.mxu1 %v3226_v0 }
 0x74c   :  { %2951 = vmatpush3.msra.mxu1 %v3421_v27 }
 0x74d   :  { %2953 = vmatmul.mubr.msk.f32.vlgmr.msra.gmra.mxu1 %vm132_vm0, %v2169_v15 }
 0x805   :  { %v2239_v49 = vpop.f32.mrf.mxu1  ;;  %v2309_v42 = vpop.f32.mrf.mxu0 }
 0x806   :  { %v2240_v24 = vadd.f32 %v3481_v50, %v2239_v49  ;;  %v2310_v25 = vadd.f32 %v3500_v4, %v2309_v42 }
 0x807   :  { %v2932_v18 = vpop.f32.mrf.mxu1  ;;  %v2943_v32 = vpop.f32.mrf.mxu0 }
 0x808   :  { %v2383_v35 = vadd.f32 %v2240_v24, %v3492_v63  ;;  %v2390_v26 = vadd.f32 %v2310_v25, %v3476_v47 }
 0x80a   :  { %v2491_v34 = vmul.f32 -1.442695, %v2383_v35  ;;  %v2492_v41 = vmul.f32 -1.442695, %v2390_v26 }
 0x80c   :  { %3037 = vpow2.f32 %v2491_v34 }
 0x80d   :  { %v2379_v46 = vpop.f32.mrf.mxu1  ;;  %3039 = vpow2.f32 %v2492_v41 }
 0x80e   :  { %v2380_v50 = vadd.f32 %v3522_v57, %v2379_v46 }
 0x80f   :  { %v2954_v0 = vpop.f32.mrf.mxu1 }
 0x819   :  { %v3038_v27 = vpop.eup %3037 }
 0x81a   :  { %v2387_v28 = vadd.f32 1.0, %v3038_v27  ;;  %v3040_v31 = vpop.eup %3039 }
 0x81b   :  { %v2394_v45 = vadd.f32 1.0, %v3040_v31 }
 0x81c   :  { %3041 = vrcp.f32 %v2387_v28 }
 0x81d   :  { %3043 = vrcp.f32 %v2394_v45 }
 0x829   :  { %v3042_v33 = vpop.eup %3041 }
 0x82a   :  { %v2397_v63 = vmul.f32 %v3042_v33, %v2380_v50  ;;  %v3044_v4 = vpop.eup %3043 }
 0x82b   :  { %v2400_v53 = vsub.f32 1.0, %v3044_v4  ;;  %v2402_v54 = vmul.f32 %v3044_v4, %v2169_v15 }
 0x82c   :  { %v2398_v48 = vadd.f32 %v2397_v63, %v3515_v44 }
 0x82e   :  { %3045 = vtanh.f32 %v2398_v48 }
 0x83b   :  { %v3046_v29 = vpop.eup %3045 }
 0x83c   :  { %v2401_v47 = vmul.f32 %v3046_v29, %v2400_v53 }
 0x83e   :  { %v2403_v51 = vadd.f32 %v2402_v54, %v2401_v47 }
 0x840   :  { %2404 = vst.msk [vmem:[#allocation14] sm:$0xff] %vm132_vm0, %v2403_v51 }
 0x841   :  { %3198 = shalt.err (!%p3195_p11)
}
 0x842   :  { %2414 = dma.vmem_to_hbm [thread:$0]  %s2412_s27, 128, %s3790_s9, [#allocation4]  }
 0x843   :  { %3215 = dma.done.wait [#allocation4], 128  }
 0x844   :  { %3216 = vsyncadd [#allocation4], 4294967168 }
 0x845   :  { %2418 = vsyncpa [#allocation3], 1 }
 0x846   :  { %2419 = vsyncpa [#allocation6], 1 }
 0x847   :  { %2420 = vsyncpa [#allocation9], 1 }
 0x848   :  { %2421 = vsyncpa [#allocation12], 1 }
 0x849   :  { %2422 = vsyncpa [#allocation4], 1 }

</bundles_post_ra>
